<compile_context>
chip_gen: v7x
topology: tpu7x:2x2x1
jax: 0.10.0
libtpu: 0.0.40
codegen_flags: <defaults>
</compile_context>

<pallas_src>
import functools

import jax
import jax.numpy as jnp
import numpy as np
from jax.experimental import pallas as pl
from jax.experimental.pallas import tpu as pltpu


def _round_up(x, m):
    return ((x + m - 1) // m) * m


def _make_tour_kernel(exact_first_match):
    """Build the per-tile kernel.

    Refs per tile (G_TILE tours, T_TILE = G_TILE * N tour edges):
      key_ref  : (T_TILE, 1)      int32   packed (src<<16)|dst per tour edge
      kfwd_ref : (1, E_pad)       int32   packed forward edge keys (-1 padded)
      krev_ref : (1, E_pad)       int32   packed reversed edge keys (-1 padded)
      eemb_ref : (E_pad, em_pad)  float32 edge embeddings (zero padded)
      out_ref  : (G_TILE, em_pad) float32 per-tour mean embeddings
    """

    def kernel(key_ref, kfwd_ref, krev_ref, eemb_ref, out_ref):
        key = key_ref[...]                     # (T, 1)
        kf = kfwd_ref[...]                     # (1, E)
        kr = krev_ref[...]                     # (1, E)

        t = key.shape[0]
        e = kf.shape[1]
        g = out_ref.shape[0]
        n = t // g

        # Single packed-key compare per direction.
        fwd = key == kf                        # (T, E)
        rev = key == kr                        # (T, E)

        if exact_first_match:
            # Priority encoding: forward matches score in [0, E), reversed in
            # [E, 2E), no match = 2E.  One cross-lane min reproduces the
            # PyTorch first-match, forward-preferred selection even with
            # duplicate edge rows.
            big = jnp.int32(2 * e)
            eidx = jax.lax.broadcasted_iota(jnp.int32, (t, e), 1)
            score = jnp.where(fwd, eidx, jnp.where(rev, eidx + e, big))
            best = jnp.min(score, axis=1, keepdims=True)          # (T, 1)
            has = best < big
            sel = jnp.where(best >= e, best - e, best)             # (T, 1)
            onehot = ((eidx == sel) & has).astype(jnp.float32)     # (T, E)
        else:
            # Fast path (edge rows unique per direction): forward matches win;
            # reversed matches contribute only when no forward match exists.
            any_fwd = jnp.any(fwd, axis=1, keepdims=True)          # (T, 1)
            onehot = (fwd | (rev & jnp.logical_not(any_fwd))).astype(jnp.float32)

        # Group mean = sublane segment-sum over the N edges of each tour,
        # scaled by 1/N (replaces the old block-diagonal MXU matmul).
        sums = jnp.sum(onehot.reshape(g, n, e), axis=1)            # (G, E)
        means = sums * jnp.float32(1.0 / n)

        # The only MXU matmul: tiny (G, E) x (E, em_pad) embedding gather.
        out_ref[...] = jnp.dot(means, eemb_ref[...],
                               preferred_element_type=jnp.float32)

    return kernel


def _vmem_plan(N, E_pad, em_pad, G, exact_first_match, single_buffer):
    """Generation-aware VMEM budget -> (G_TILE, vmem_limit_bytes)."""
    try:
        cap = int(pltpu.get_tpu_info().vmem_capacity_bytes)
    except Exception:
        cap = 64 * 1024 * 1024                    # conservative (v7x per-TC)

    if cap <= 96 * 1024 * 1024:                   # v7x: 64 MiB physical
        vmem_limit = 48 * 1024 * 1024
    else:                                         # v5e / v6e: 128 MiB
        vmem_limit = 96 * 1024 * 1024
    vmem_limit = min(vmem_limit, cap)

    inv_bufs = 1 if single_buffer else 2
    # Resident, grid-invariant inputs: edge embeddings + both packed key rows
    # (sublane-padded to 8 rows each).
    resident = inv_bufs * 4 * (E_pad * em_pad + 2 * 8 * E_pad)
    # Per-group tiled I/O, double-buffered: tour keys (T_TILE, 1) pad to 128
    # lanes in VMEM, plus the (G_TILE, em_pad) output block.
    per_group_io = 2 * 4 * (N * 128 + em_pad)
    # Per-group (T, E) compare temporaries (fwd/rev/score/onehot/...).
    passes = 6 if exact_first_match else 4
    per_group_tmp = passes * 4 * N * E_pad

    usable = vmem_limit - resident - (2 << 20)    # 2 MiB headroom
    per_group = per_group_io + per_group_tmp
    g_budget = max(8, (max(usable, 8 * per_group) // per_group) // 8 * 8)

    G_TILE = int(min(g_budget, 512, _round_up(G, 8)))
    if G >= 16:
        # Guarantee >= 2 grid tiles: shards the "parallel" axis across both
        # v7x TensorCores and keeps the input/output DMAs pipelined.
        G_TILE = min(G_TILE, _round_up(-(-G // 2), 8))
    return G_TILE, vmem_limit


@functools.partial(jax.jit,
                   static_argnames=("emsize", "exact_first_match",
                                    "single_buffer_invariants"))
def tsp_tour_encoder(y, edge_index, edge_emb, node_offset_map, emsize,
                     exact_first_match=True, single_buffer_invariants=True):
    """JAX wrapper: index glue + one tiled pallas_call doing all the compute.

    y               : (S, B, N) int32 tour indices (local node labels 0..N-1)
    edge_index      : (2, E)    int32 global (src, dst) node ids per edge
    edge_emb        : (E, em)   float32
    node_offset_map : (S, B, N) int32  (pos, b, node) -> global node id
    returns         : (S, B, em) float32

    Caller contract (NOT checked at runtime -- no host sync): all global node
    ids lie in [0, 2**16 - 2] so they pack into 16-bit key halves and can
    never collide with the -1 / -2 padding sentinels.  Ids >= 2**15 make the
    packed int32 key negative via shift wrap-around; comparisons stay
    consistent because both sides are packed identically.
    """
    S, B, N = y.shape
    E, em = edge_emb.shape
    assert em == emsize

    nom = node_offset_map.astype(jnp.int32)
    eidx32 = edge_index.astype(jnp.int32)

    # Tour edges (y[n], y[(n+1) % N]) per position/batch, as global ids,
    # packed into one 32-bit key each.
    src_local = y.astype(jnp.int32)
    dst_local = jnp.roll(src_local, shift=-1, axis=-1)
    gsrc = jnp.take_along_axis(nom, src_local, axis=-1)        # (S, B, N)
    gdst = jnp.take_along_axis(nom, dst_local, axis=-1)        # (S, B, N)
    tour_key = ((gsrc << 16) | gdst).reshape(S * B * N, 1)     # (T, 1)

    esrc, edst = eidx32[0], eidx32[1]
    kfwd = (esrc << 16) | edst
    krev = (edst << 16) | esrc

    # Pad the edge axis to a lane multiple; sentinel keys (-1) can never match
    # a real packed key and carry zero embedding rows, so they never contribute.
    E_pad = _round_up(max(E, 128), 128)
    pad_e = E_pad - E
    kfwd = jnp.concatenate(
        [kfwd, jnp.full((pad_e,), -1, jnp.int32)]).reshape(1, E_pad)
    krev = jnp.concatenate(
        [krev, jnp.full((pad_e,), -1, jnp.int32)]).reshape(1, E_pad)

    # Pad the embedding dim to 128 so the output store is lane-dense.
    em_pad = _round_up(max(em, 128), 128)
    eemb = jnp.pad(edge_emb.astype(jnp.float32),
                   ((0, pad_e), (0, em_pad - em)))

    G = S * B
    G_TILE, vmem_limit = _vmem_plan(N, E_pad, em_pad, G, exact_first_match,
                                    single_buffer_invariants)
    G_pad = _round_up(G, G_TILE)
    T_TILE = G_TILE * N
    num_tiles = G_pad // G_TILE

    if G_pad > G:
        # Padding tours get key -2, which matches neither a real edge key nor
        # the -1 edge sentinel; their output rows are sliced off below.
        tour_key = jnp.concatenate(
            [tour_key, jnp.full(((G_pad - G) * N, 1), -2, jnp.int32)], axis=0)

    def inv_spec(shape):
        # Grid-invariant input (constant index_map).  Single-buffer it to
        # halve the resident VMEM footprint when requested.
        idx_map = lambda i: (0,) * len(shape)
        if single_buffer_invariants:
            return pl.BlockSpec(shape, idx_map, pipeline_mode=pl.Buffered(1))
        return pl.BlockSpec(shape, idx_map)

    out = pl.pallas_call(
        _make_tour_kernel(exact_first_match),
        out_shape=jax.ShapeDtypeStruct((G_pad, em_pad), jnp.float32),
        grid=(num_tiles,),
        in_specs=[
            pl.BlockSpec((T_TILE, 1), lambda i: (i, 0)),   # tour keys (tiled)
            inv_spec((1, E_pad)),                          # fwd edge keys
            inv_spec((1, E_pad)),                          # rev edge keys
            inv_spec((E_pad, em_pad)),                     # edge embeddings
        ],
        out_specs=pl.BlockSpec((G_TILE, em_pad), lambda i: (i, 0)),
        compiler_params=pltpu.CompilerParams(
            dimension_semantics=("parallel",),
            vmem_limit_bytes=vmem_limit),
    )(tour_key, kfwd, krev, eemb)

    # TODO(synk): for very large edge sets (resident eemb + (T, E) temporaries
    # approaching the VMEM limit) add a second "arbitrary" grid axis over E
    # with a running best-score / selected-embedding VMEM scratch.
    return out[:G, :em].reshape(S, B, em)


def _reference(y, nom, esrc, edst, eemb, emsize):
    """Pure numpy re-implementation of the PyTorch loop semantics."""
    S, B, N = y.shape
    out = np.zeros((S, B, emsize), dtype=np.float32)
    for pos in range(S):
        for b in range(B):
            tour = y[pos, b]
            vecs = []
            for n in range(N):
                s_loc, d_loc = int(tour[n]), int(tour[(n + 1) % N])
                gs = int(nom[pos, b, s_loc])
                gd = int(nom[pos, b, d_loc])
                mask = (esrc == gs) & (edst == gd)
                if not mask.any():
                    mask = (esrc == gd) & (edst == gs)
                if mask.any():
                    vecs.append(eemb[np.where(mask)[0][0]])
                else:
                    vecs.append(np.zeros(emsize, dtype=np.float32))
            out[pos, b] = np.stack(vecs, axis=0).mean(axis=0)
    return out


if __name__ == "__main__":
    # Small deterministic problem: seq=4, batch=4, nodes=8, emsize=32.
    # G = 16 tour groups -> 2 parallel grid tiles of 8 groups each.
    S, B, N, EMSIZE = 4, 4, 8, 32
    key = jax.random.PRNGKey(0)

    # Tours: a random permutation of the N local node labels per (pos, b).
    k_perm, k_emb = jax.random.split(key)
    perm_keys = jax.random.split(k_perm, S * B)
    tours = jnp.stack([jax.random.permutation(k, N) for k in perm_keys], 0)
    y = tours.reshape(S, B, N).astype(jnp.int32)

    # node_offset_map densified: (pos, b, node) -> global node id.
    group = jnp.arange(S)[:, None] * B + jnp.arange(B)[None, :]        # (S, B)
    nom = (group[:, :, None] * N + jnp.arange(N)[None, None, :]).astype(jnp.int32)

    # edge_index: per (pos, b) group, directed edges (i, j) with i < j, so some
    # tour edges hit the forward branch and some the reversed fallback.
    srcs, dsts = [], []
    for g in range(S * B):
        for i in range(N):
            for j in range(i + 1, N):
                srcs.append(g * N + i)
                dsts.append(g * N + j)
    edge_index = jnp.asarray([srcs, dsts], dtype=jnp.int32)            # (2, E)
    E = edge_index.shape[1]
    edge_emb = jax.random.normal(k_emb, (E, EMSIZE), dtype=jnp.float32)

    ref = _reference(np.asarray(y), np.asarray(nom),
                     np.asarray(edge_index[0]), np.asarray(edge_index[1]),
                     np.asarray(edge_emb), EMSIZE)

    def run_and_check(single_buffer):
        # Exact first-match path (always PyTorch-equivalent).
        out_exact = jax.block_until_ready(
            tsp_tour_encoder(y, edge_index, edge_emb, nom, EMSIZE,
                             exact_first_match=True,
                             single_buffer_invariants=single_buffer))
        np.testing.assert_allclose(np.asarray(out_exact), ref,
                                   rtol=1e-5, atol=1e-5)
        # Fast path (valid here: edge rows are unique per direction).
        out_fast = jax.block_until_ready(
            tsp_tour_encoder(y, edge_index, edge_emb, nom, EMSIZE,
                             exact_first_match=False,
                             single_buffer_invariants=single_buffer))
        np.testing.assert_allclose(np.asarray(out_fast), ref,
                                   rtol=1e-5, atol=1e-5)

    try:
        run_and_check(True)
    except Exception:
        # Fallback if this Pallas build rejects single-buffered (Buffered(1))
        # grid-invariant inputs; correctness is identical either way.
        run_and_check(False)

    # TODO(synk): the position/batch dict-scanning fallback branch of the
    # PyTorch forward (Python dict iteration) is not translated; only the
    # node_offset_map path (the functional one) is implemented.
    print("KERNEL_OK")
</pallas_src>

<mosaic_0001>
module attributes {stable_mosaic.version = 11 : i64} {
  func.func @kernel(%arg0: i32, %arg1: memref<64x1xi32, #tpu.memory_space<vmem>>, %arg2: memref<1x512xi32, #tpu.memory_space<vmem>>, %arg3: memref<1x512xi32, #tpu.memory_space<vmem>>, %arg4: memref<512x128xf32, #tpu.memory_space<vmem>>, %arg5: memref<8x128xf32, #tpu.memory_space<vmem>>) attributes {dimension_semantics = [#tpu.dimension_semantics<parallel>], iteration_bounds = array<i64: 2>, scalar_prefetch = 0 : i64, scratch_operands = 0 : i64, tpu.core_type = #tpu.core_type<tc>, window_params = [{transform_indices = @transform_0, window_bounds = array<i64: 64, 1>}, {pipeline_mode = #tpu.pipeline_mode<synchronous>, transform_indices = @transform_1, window_bounds = array<i64: 1, 512>}, {pipeline_mode = #tpu.pipeline_mode<synchronous>, transform_indices = @transform_2, window_bounds = array<i64: 1, 512>}, {pipeline_mode = #tpu.pipeline_mode<synchronous>, transform_indices = @transform_3, window_bounds = array<i64: 512, 128>}, {transform_indices = @transform_4, window_bounds = array<i64: 8, 128>}]} {
    %c0 = arith.constant 0 : index
    %c0_0 = arith.constant 0 : index
    %0 = vector.load %arg1[%c0, %c0_0] : memref<64x1xi32, #tpu.memory_space<vmem>>, vector<64x1xi32>
    %c0_1 = arith.constant 0 : index
    %c0_2 = arith.constant 0 : index
    %1 = vector.load %arg2[%c0_1, %c0_2] : memref<1x512xi32, #tpu.memory_space<vmem>>, vector<1x512xi32>
    %c0_3 = arith.constant 0 : index
    %c0_4 = arith.constant 0 : index
    %2 = vector.load %arg3[%c0_3, %c0_4] : memref<1x512xi32, #tpu.memory_space<vmem>>, vector<1x512xi32>
    %3 = vector.broadcast %0 : vector<64x1xi32> to vector<64x512xi32>
    %4 = vector.broadcast %1 : vector<1x512xi32> to vector<64x512xi32>
    %5 = arith.cmpi eq, %3, %4 : vector<64x512xi32>
    %6 = vector.broadcast %0 : vector<64x1xi32> to vector<64x512xi32>
    %7 = vector.broadcast %2 : vector<1x512xi32> to vector<64x512xi32>
    %8 = arith.cmpi eq, %6, %7 : vector<64x512xi32>
    %9 = tpu.iota {dimensions = array<i32: 1>} : vector<64x512xi32>
    %c512_i32 = arith.constant 512 : i32
    %10 = vector.broadcast %c512_i32 : i32 to vector<64x512xi32>
    %11 = arith.addi %9, %10 : vector<64x512xi32>
    %c1024_i32 = arith.constant 1024 : i32
    %12 = vector.broadcast %c1024_i32 : i32 to vector<64x512xi32>
    %13 = arith.select %8, %11, %12 : vector<64x512xi1>, vector<64x512xi32>
    %14 = arith.select %5, %9, %13 : vector<64x512xi1>, vector<64x512xi32>
    %cst = arith.constant dense<2147483647> : vector<64xi32>
    %15 = vector.multi_reduction <minsi>, %14, %cst [1] : vector<64x512xi32> to vector<64xi32>
    %16 = vector.shape_cast %15 : vector<64xi32> to vector<64x1xi32>
    %c1024_i32_5 = arith.constant 1024 : i32
    %17 = vector.broadcast %c1024_i32_5 : i32 to vector<64x1xi32>
    %18 = arith.cmpi slt, %16, %17 : vector<64x1xi32>
    %c512_i32_6 = arith.constant 512 : i32
    %19 = vector.broadcast %c512_i32_6 : i32 to vector<64x1xi32>
    %20 = arith.cmpi sge, %16, %19 : vector<64x1xi32>
    %c512_i32_7 = arith.constant 512 : i32
    %21 = vector.broadcast %c512_i32_7 : i32 to vector<64x1xi32>
    %22 = arith.subi %16, %21 : vector<64x1xi32>
    %23 = arith.select %20, %22, %16 : vector<64x1xi1>, vector<64x1xi32>
    %24 = vector.broadcast %23 : vector<64x1xi32> to vector<64x512xi32>
    %25 = arith.cmpi eq, %9, %24 : vector<64x512xi32>
    %26 = vector.broadcast %18 : vector<64x1xi1> to vector<64x512xi1>
    %27 = arith.andi %25, %26 : vector<64x512xi1>
    %28 = arith.extui %27 : vector<64x512xi1> to vector<64x512xi32>
    %29 = arith.sitofp %28 : vector<64x512xi32> to vector<64x512xf32>
    %30 = vector.shape_cast %29 : vector<64x512xf32> to vector<8x8x512xf32>
    %cst_8 = arith.constant dense<0.000000e+00> : vector<8x512xf32>
    %31 = vector.multi_reduction <add>, %30, %cst_8 [1] : vector<8x8x512xf32> to vector<8x512xf32>
    %cst_9 = arith.constant 1.250000e-01 : f32
    %32 = vector.broadcast %cst_9 : f32 to vector<8x512xf32>
    %33 = arith.mulf %31, %32 : vector<8x512xf32>
    %c0_10 = arith.constant 0 : index
    %c0_11 = arith.constant 0 : index
    %34 = vector.load %arg4[%c0_10, %c0_11] : memref<512x128xf32, #tpu.memory_space<vmem>>, vector<512x128xf32>
    %cst_12 = arith.constant dense<0.000000e+00> : vector<8x128xf32>
    %35 = tpu.matmul %33, %34, %cst_12 {dimension_numbers = #tpu.dot_dimension_numbers<[1], [0], [0], [1], [0, 0, 1, 1], [], []>} : vector<8x512xf32>, vector<512x128xf32>, vector<8x128xf32> -> vector<8x128xf32>
    %c0_13 = arith.constant 0 : index
    %c0_14 = arith.constant 0 : index
    %36 = vector.load %arg5[%c0_13, %c0_14] : memref<8x128xf32, #tpu.memory_space<vmem>>, vector<8x128xf32>
    tpu.vector_store %arg5[%c0_13, %c0_14], %35 {strides = array<i32>} : memref<8x128xf32, #tpu.memory_space<vmem>>, vector<8x128xf32>,
    return
  }
  func.func @transform_0(%arg0: i32) -> (i32, i32) {
    %c0_i32 = arith.constant 0 : i32
    %c0_i32_0 = arith.constant 0 : i32
    return %arg0, %c0_i32 : i32, i32
  }
  func.func @transform_1(%arg0: i32) -> (i32, i32) {
    %c0_i32 = arith.constant 0 : i32
    %c0_i32_0 = arith.constant 0 : i32
    %c0_i32_1 = arith.constant 0 : i32
    return %c0_i32, %c0_i32_0 : i32, i32
  }
  func.func @transform_2(%arg0: i32) -> (i32, i32) {
    %c0_i32 = arith.constant 0 : i32
    %c0_i32_0 = arith.constant 0 : i32
    %c0_i32_1 = arith.constant 0 : i32
    return %c0_i32, %c0_i32_0 : i32, i32
  }
  func.func @transform_3(%arg0: i32) -> (i32, i32) {
    %c0_i32 = arith.constant 0 : i32
    %c0_i32_0 = arith.constant 0 : i32
    %c0_i32_1 = arith.constant 0 : i32
    return %c0_i32, %c0_i32_0 : i32, i32
  }
  func.func @transform_4(%arg0: i32) -> (i32, i32) {
    %c0_i32 = arith.constant 0 : i32
    %c0_i32_0 = arith.constant 0 : i32
    return %arg0, %c0_i32 : i32, i32
  }
}

module attributes {stable_mosaic.version = 11 : i64} {
  func.func @kernel(%arg0: i32, %arg1: memref<64x1xi32, #tpu.memory_space<vmem>>, %arg2: memref<1x512xi32, #tpu.memory_space<vmem>>, %arg3: memref<1x512xi32, #tpu.memory_space<vmem>>, %arg4: memref<512x128xf32, #tpu.memory_space<vmem>>, %arg5: memref<8x128xf32, #tpu.memory_space<vmem>>) attributes {dimension_semantics = [#tpu.dimension_semantics<parallel>], iteration_bounds = array<i64: 2>, scalar_prefetch = 0 : i64, scratch_operands = 0 : i64, tpu.core_type = #tpu.core_type<tc>, window_params = [{transform_indices = @transform_0, window_bounds = array<i64: 64, 1>}, {pipeline_mode = #tpu.pipeline_mode<synchronous>, transform_indices = @transform_1, window_bounds = array<i64: 1, 512>}, {pipeline_mode = #tpu.pipeline_mode<synchronous>, transform_indices = @transform_2, window_bounds = array<i64: 1, 512>}, {pipeline_mode = #tpu.pipeline_mode<synchronous>, transform_indices = @transform_3, window_bounds = array<i64: 512, 128>}, {transform_indices = @transform_4, window_bounds = array<i64: 8, 128>}]} {
    %c0 = arith.constant 0 : index
    %c0_0 = arith.constant 0 : index
    %0 = vector.load %arg1[%c0, %c0_0] : memref<64x1xi32, #tpu.memory_space<vmem>>, vector<64x1xi32>
    %c0_1 = arith.constant 0 : index
    %c0_2 = arith.constant 0 : index
    %1 = vector.load %arg2[%c0_1, %c0_2] : memref<1x512xi32, #tpu.memory_space<vmem>>, vector<1x512xi32>
    %c0_3 = arith.constant 0 : index
    %c0_4 = arith.constant 0 : index
    %2 = vector.load %arg3[%c0_3, %c0_4] : memref<1x512xi32, #tpu.memory_space<vmem>>, vector<1x512xi32>
    %3 = vector.broadcast %0 : vector<64x1xi32> to vector<64x512xi32>
    %4 = vector.broadcast %1 : vector<1x512xi32> to vector<64x512xi32>
    %5 = arith.cmpi eq, %3, %4 : vector<64x512xi32>
    %6 = vector.broadcast %0 : vector<64x1xi32> to vector<64x512xi32>
    %7 = vector.broadcast %2 : vector<1x512xi32> to vector<64x512xi32>
    %8 = arith.cmpi eq, %6, %7 : vector<64x512xi32>
    %9 = tpu.iota {dimensions = array<i32: 1>} : vector<64x512xi32>
    %c512_i32 = arith.constant 512 : i32
    %10 = vector.broadcast %c512_i32 : i32 to vector<64x512xi32>
    %11 = arith.addi %9, %10 : vector<64x512xi32>
    %c1024_i32 = arith.constant 1024 : i32
    %12 = vector.broadcast %c1024_i32 : i32 to vector<64x512xi32>
    %13 = arith.select %8, %11, %12 : vector<64x512xi1>, vector<64x512xi32>
    %14 = arith.select %5, %9, %13 : vector<64x512xi1>, vector<64x512xi32>
    %cst = arith.constant dense<2147483647> : vector<64xi32>
    %15 = vector.multi_reduction <minsi>, %14, %cst [1] : vector<64x512xi32> to vector<64xi32>
    %16 = vector.shape_cast %15 : vector<64xi32> to vector<64x1xi32>
    %c1024_i32_5 = arith.constant 1024 : i32
    %17 = vector.broadcast %c1024_i32_5 : i32 to vector<64x1xi32>
    %18 = arith.cmpi slt, %16, %17 : vector<64x1xi32>
    %c512_i32_6 = arith.constant 512 : i32
    %19 = vector.broadcast %c512_i32_6 : i32 to vector<64x1xi32>
    %20 = arith.cmpi sge, %16, %19 : vector<64x1xi32>
    %c512_i32_7 = arith.constant 512 : i32
    %21 = vector.broadcast %c512_i32_7 : i32 to vector<64x1xi32>
    %22 = arith.subi %16, %21 : vector<64x1xi32>
    %23 = arith.select %20, %22, %16 : vector<64x1xi1>, vector<64x1xi32>
    %24 = vector.broadcast %23 : vector<64x1xi32> to vector<64x512xi32>
    %25 = arith.cmpi eq, %9, %24 : vector<64x512xi32>
    %26 = vector.broadcast %18 : vector<64x1xi1> to vector<64x512xi1>
    %27 = arith.andi %25, %26 : vector<64x512xi1>
    %28 = arith.extui %27 : vector<64x512xi1> to vector<64x512xi32>
    %29 = arith.sitofp %28 : vector<64x512xi32> to vector<64x512xf32>
    %30 = vector.shape_cast %29 : vector<64x512xf32> to vector<8x8x512xf32>
    %cst_8 = arith.constant dense<0.000000e+00> : vector<8x512xf32>
    %31 = vector.multi_reduction <add>, %30, %cst_8 [1] : vector<8x8x512xf32> to vector<8x512xf32>
    %cst_9 = arith.constant 1.250000e-01 : f32
    %32 = vector.broadcast %cst_9 : f32 to vector<8x512xf32>
    %33 = arith.mulf %31, %32 : vector<8x512xf32>
    %c0_10 = arith.constant 0 : index
    %c0_11 = arith.constant 0 : index
    %34 = vector.load %arg4[%c0_10, %c0_11] : memref<512x128xf32, #tpu.memory_space<vmem>>, vector<512x128xf32>
    %cst_12 = arith.constant dense<0.000000e+00> : vector<8x128xf32>
    %35 = tpu.matmul %33, %34, %cst_12 {dimension_numbers = #tpu.dot_dimension_numbers<[1], [0], [0], [1], [0, 0, 1, 1], [], []>} : vector<8x512xf32>, vector<512x128xf32>, vector<8x128xf32> -> vector<8x128xf32>
    %c0_13 = arith.constant 0 : index
    %c0_14 = arith.constant 0 : index
    %36 = vector.load %arg5[%c0_13, %c0_14] : memref<8x128xf32, #tpu.memory_space<vmem>>, vector<8x128xf32>
    tpu.vector_store %arg5[%c0_13, %c0_14], %35 {strides = array<i32>} : memref<8x128xf32, #tpu.memory_space<vmem>>, vector<8x128xf32>,
    return
  }
  func.func @transform_0(%arg0: i32) -> (i32, i32) {
    %c0_i32 = arith.constant 0 : i32
    %c0_i32_0 = arith.constant 0 : i32
    return %arg0, %c0_i32 : i32, i32
  }
  func.func @transform_1(%arg0: i32) -> (i32, i32) {
    %c0_i32 = arith.constant 0 : i32
    %c0_i32_0 = arith.constant 0 : i32
    %c0_i32_1 = arith.constant 0 : i32
    return %c0_i32, %c0_i32_0 : i32, i32
  }
  func.func @transform_2(%arg0: i32) -> (i32, i32) {
    %c0_i32 = arith.constant 0 : i32
    %c0_i32_0 = arith.constant 0 : i32
    %c0_i32_1 = arith.constant 0 : i32
    return %c0_i32, %c0_i32_0 : i32, i32
  }
  func.func @transform_3(%arg0: i32) -> (i32, i32) {
    %c0_i32 = arith.constant 0 : i32
    %c0_i32_0 = arith.constant 0 : i32
    %c0_i32_1 = arith.constant 0 : i32
    return %c0_i32, %c0_i32_0 : i32, i32
  }
  func.func @transform_4(%arg0: i32) -> (i32, i32) {
    %c0_i32 = arith.constant 0 : i32
    %c0_i32_0 = arith.constant 0 : i32
    return %arg0, %c0_i32 : i32, i32
  }
}

</mosaic_0001>

<bundles_post_ra>
// kernel: tsp_tour_encoder.1
= control target key start
LH: loop header
LB: loop body
LE: loop exit
PB: predicated region body
PF: predicated region fallthrough
CT: control target
= control target key end

     0   :  { %9 = vsyncpa [#allocation3], 0  ;;  %s2557_s0 = inlined_call_operand.vmem [shape: s32[128,1], index: 0, kind: input, shape index: {}]   ;;  %s2558_s1 = inlined_call_operand.vmem [shape: s32[1,512], index: 1, kind: input, shape index: {}]   ;;  %s2559_s2 = inlined_call_operand.vmem [shape: s32[1,512], index: 2, kind: input, shape index: {}]   ;;  %s2560_s3 = inlined_call_operand.vmem [shape: f32[512,128], index: 3, kind: input, shape index: {}]   ;;  %s2561_s4 = inlined_call_operand.hbm [shape: f32[16,128], index: 4, kind: output, shape index: {}]  }
   0x1   :  { %11 = vsyncpa [#allocation3 + $0x1], 0  ;;  %s1630_s15 = smov 0   ;;  %s1632_s16 = smov 0  }
   0x2   :  { %s1634_s17 = smov 0   ;;  %s1636_s18 = smov 0  }
   0x3 LB: > { %s1651_s19 = sadd.s32 4294967295, %s1600_s18   ;;  %s1310_s20 = sadd.s32 4294967294, %s1600_s18   ;;  %s1600_s18 = sphi %s1636_s18, %s2573_s18   ;;  %s1596_s17 = sphi %s1634_s17, %s2572_s17   ;;  %s1592_s16 = sphi %s1632_s16, %s2571_s16   ;;  %s1588_s15 = sphi %s1630_s15, %s2570_s15  }
   0x4   : > { %s1655_s21 = sadd.s32 1, %s1600_s18   ;;  %s113_s22 = sadd.s32 1, %s1596_s17 }
   0x5   : > { %s110_s23 = ssub.s32 %s1600_s18, %s1655_s21  ;;  %p123_p0 = scmp.ne.s32.totalorder %s1596_s17, %s1592_s16 }
   0x6   : > { %p111_p1 = scmp.eq.s32.totalorder %s110_s23, 0  ;;  %p124_p2 = scmp.eq.s32.totalorder %s1651_s19, 1 }
   0x7   : > { %p129_p3 = scmp.ne.s32.totalorder %s1592_s16, %s1588_s15  ;;  %p130_p4 = scmp.eq.s32.totalorder %s1310_s20, 1 }
   0x8   : > { %s1666_s24 = scalar_select %p111_p1, %s1596_s17, %s113_s22  }
   0x9   : > { %p1668_p5 = por %p124_p2, %p123_p0  ;;  %p1672_p6 = por %p130_p4, %p129_p3 }
   0xa   : > { %p1313_p7 = scmp.ge.s32.totalorder %s1600_s18, 1  ;;  %p166_p8 = scmp.lt.s32.totalorder %s1600_s18, 3 }
   0xc   : > { %p167_p9 = pnand %p1313_p7, %p166_p8 }
   0xd   : > { %s1315_s27 = sshll.u32 (!%p167_p9), %s1651_s19, 3  ;;  %v1602_v0 = vmov (!%p167_p9), 0   ;;  %v232_v9 = vlaneseq (!%p167_p9)  ;;  %v206_v16 = vld [vmem:[%s2558_s1] sm:$0xf] (!%p167_p9)  ;;  %s1358_s30 = sshll.u32 (!%p167_p9), %s1651_s19, 7 }
   0xe   : > { %170 = sbr.rel (%p167_p9) target bundleno = 790 (0x316), region = 36  ;;  %1537 = vset.pattern.permute.xlu1 (!%p167_p9), %v1602_v0  ;;  %1536 = vset.pattern.permute.xlu0 (!%p167_p9), %v1602_v0  ;;  %p193_p10 = scmp.lt.s32.totalorder (!%p167_p9), %s1315_s27, 15  ;;  %v207_v17 = vld [vmem:[%s2559_s2] sm:$0xf] (!%p167_p9) }
   0xf   : > { %v233_v10 = vshrl.u32 (!%p167_p9), %v232_v9, 7  ;;  %v1682_v11 = vand.u32 (!%p167_p9), 127, %v232_v9  ;;  %s2515_s9 = scalar_lea.hbm (!%p167_p9), %s2561_s4, %s1358_s30  ;;  %s1604_s19 = smov (!%p167_p9), [#allocation2]  }
  0x10   : > { %s1542_s12 = sshll.u32 (!%p167_p9), %s1604_s19, 4  ;;  %s1543_s12 = int_to_ptr.vmem [resolvable:$false] %s1542_s12 }
  0x11   : > { %v234_v12 = vsub.s32 (!%p167_p9), 0, %v233_v10  ;;  %v238_v13 = vsub.s32 (!%p167_p9), 1, %v233_v10  ;;  %v242_v14 = vsub.s32 (!%p167_p9), 2, %v233_v10  ;;  %v246_v15 = vsub.s32 (!%p167_p9), 3, %v233_v10  ;;  %s1544_s13 = scalar_lea.vmem (!%p167_p9), %s1543_s12, 256 }
  0x12   : > { %v1691_v18 = vadd.s32 (!%p167_p9), 128, %v1682_v11  ;;  %v1694_v19 = vadd.s32 (!%p167_p9), 256, %v1682_v11  ;;  %v1697_v20 = vadd.s32 (!%p167_p9), 384, %v1682_v11  ;;  %v1716_v29 = vadd.s32 (!%p167_p9), 512, %v1682_v11 }
  0x13   : > { %v1699_v21 = vrot.slane (!%p167_p9), %v206_v16, %v234_v12  ;;  %v1701_v22 = vrot.slane (!%p167_p9), %v206_v16, %v238_v13  ;;  %v1703_v23 = vrot.slane (!%p167_p9), %v206_v16, %v242_v14  ;;  %v1705_v24 = vrot.slane (!%p167_p9), %v206_v16, %v246_v15 }
  0x14   : > { %v1707_v25 = vrot.slane (!%p167_p9), %v207_v17, %v234_v12  ;;  %v1709_v26 = vrot.slane (!%p167_p9), %v207_v17, %v238_v13  ;;  %v1711_v27 = vrot.slane (!%p167_p9), %v207_v17, %v242_v14  ;;  %v1713_v28 = vrot.slane (!%p167_p9), %v207_v17, %v246_v15 }
  0x15   : > { %s2575_s27 = smov (!%p193_p10, %s1315_s27), 15  ;;  %v1719_v30 = vadd.s32 512, %v1691_v18  ;;  %v1722_v31 = vadd.s32 512, %v1694_v19  ;;  %v1725_v32 = vadd.s32 512, %v1697_v20 }
  0x16   : > { %s1316_s28 = sshll.u32 %s2575_s27, 3 }
  0x17   : > { %s196_s5 = scalar_lea.vmem %s2557_s0, %s1316_s28  ;;  %s189_s28 = sand.u32 1, %s1592_s16  }
  0x18   : > { %v200_v1 = vld [vmem:[%s196_s5 + $0x10] sm:$0xff]  ;;  %v198_v2 = vld [vmem:[%s196_s5] sm:$0xff]  ;;  %v201_v3 = vld [vmem:[%s196_s5 + $0x18] sm:$0xff]  ;;  %s1314_s29 = sshll.u32 %s189_s28, 3  ;;  %s1238_s10 = scalar_lea.sflag [#allocation3], %s189_s28 }
  0x19   : > { %215 = vperm.xlu1 %1537, %v200_v1   ;;  %209 = vperm.xlu0 %1536, %v198_v2   ;;  %v199_v4 = vld [vmem:[%s196_s5 + $0x8] sm:$0xff]  ;;  %v202_v6 = vld [vmem:[%s196_s5 + $0x20] sm:$0xff]  ;;  %v205_v7 = vld [vmem:[%s196_s5 + $0x38] sm:$0xff] }
  0x1a   : > { %v203_v5 = vld [vmem:[%s196_s5 + $0x28] sm:$0xff]  ;;  %v204_v8 = vld [vmem:[%s196_s5 + $0x30] sm:$0xff]  ;;  %s191_s5 = scalar_lea.vmem [#allocation2], %s1314_s29 }
  0x1b   : > { %s1251_s6 = sshll.u32 %s191_s5, 4  ;;  %s2517_s6 = int_to_ptr.vmem [resolvable:$true] %s1251_s6 }
  0x1c   : > { %s1538_s11 = scalar_lea.vmem %s2517_s6, 128  ;;  %p1545_p0 = scmp.lt.s32.totalorder %s2517_s6, %s1543_s12 }
  0x1d   : > { %218 = vperm.xlu1 %1537, %v201_v3   ;;  %212 = vperm.xlu0 %1536, %v199_v4   ;;  %p1539_p11 = scmp.ne.s32.totalorder %s2517_s6, %s1538_s11  ;;  %p1546_p1 = scmp.lt.s32.totalorder %s1544_s13, %s1538_s11 }
  0x1f   : > { %p1540_p12 = pnand %p1539_p11, %p1668_p5  ;;  %p1547_p2 = por %p1546_p1, %p1545_p0 }
  0x21   : > { %224 = vperm.xlu1 %1537, %v203_v5   ;;  %221 = vperm.xlu0 %1536, %v202_v6   ;;  %p1541_p13 = pneg %p1540_p12 }
  0x23   : > { %p1548_p3 = pnand %p1547_p2, %p1541_p13 }
  0x25   : > { %230 = vperm.xlu1 %1537, %v205_v7   ;;  %227 = vperm.xlu0 %1536, %v204_v8  }
  0x98   : > { %v210_v33 = vpop.permute.xlu0 %209  ;;  %v216_v34 = vpop.permute.xlu1 %215 }
  0x99   : > { %vm248_vm0 = vcmp.eq.s32.totalorder %v210_v33, %v1699_v21  ;;  %vm249_vm1 = vcmp.eq.s32.totalorder %v210_v33, %v1701_v22  ;;  %vm250_vm2 = vcmp.eq.s32.totalorder %v210_v33, %v1703_v23  ;;  %vm251_vm3 = vcmp.eq.s32.totalorder %v210_v33, %v1705_v24 }
  0x9a   : > { %vm296_vm4 = vcmp.eq.s32.totalorder %v210_v33, %v1707_v25  ;;  %vm297_vm5 = vcmp.eq.s32.totalorder %v210_v33, %v1709_v26  ;;  %vm298_vm6 = vcmp.eq.s32.totalorder %v210_v33, %v1711_v27  ;;  %vm299_vm7 = vcmp.eq.s32.totalorder %v210_v33, %v1713_v28 }
  0x9b   : > { %v337_v35 = vsel %vm296_vm4, %v1716_v29, 1024  ;;  %v338_v36 = vsel %vm297_vm5, %v1719_v30, 1024  ;;  %v339_v37 = vsel %vm298_vm6, %v1722_v31, 1024  ;;  %v340_v38 = vsel %vm299_vm7, %v1725_v32, 1024 }
  0x9c   : > { %v369_v39 = vsel %vm248_vm0, %v1682_v11, %v337_v35  ;;  %v370_v40 = vsel %vm249_vm1, %v1691_v18, %v338_v36  ;;  %v371_v41 = vsel %vm250_vm2, %v1694_v19, %v339_v37  ;;  %v372_v42 = vsel %vm251_vm3, %v1697_v20, %v340_v38  ;;  %v213_v44 = vpop.permute.xlu0 %212  ;;  %v219_v59 = vpop.permute.xlu1 %218 }
  0x9d   : > { %vm401_vm8 = vcmp.lt.s32.totalorder %v369_v39, %v370_v40  ;;  %vm256_vm9 = vcmp.eq.s32.totalorder %v216_v34, %v1699_v21  ;;  %vm257_vm10 = vcmp.eq.s32.totalorder %v216_v34, %v1701_v22  ;;  %vm258_vm11 = vcmp.eq.s32.totalorder %v216_v34, %v1703_v23 }
  0x9e   : > { %v402_v43 = vsel %vm401_vm8, %v369_v39, %v370_v40  ;;  %vm259_vm12 = vcmp.eq.s32.totalorder %v216_v34, %v1705_v24  ;;  %vm304_vm13 = vcmp.eq.s32.totalorder %v216_v34, %v1707_v25  ;;  %vm305_vm14 = vcmp.eq.s32.totalorder %v216_v34, %v1709_v26 }
  0x9f   : > { %vm403_vm15 = vcmp.lt.s32.totalorder %v402_v43, %v371_v41  ;;  %vm306_vm0 = vcmp.eq.s32.totalorder %v216_v34, %v1711_v27  ;;  %vm307_vm1 = vcmp.eq.s32.totalorder %v216_v34, %v1713_v28  ;;  %v345_v45 = vsel %vm304_vm13, %v1716_v29, 1024 }
  0xa0   : > { %v404_v46 = vsel %vm403_vm15, %v402_v43, %v371_v41  ;;  %v346_v47 = vsel %vm305_vm14, %v1719_v30, 1024  ;;  %v347_v48 = vsel %vm306_vm0, %v1722_v31, 1024  ;;  %v348_v49 = vsel %vm307_vm1, %v1725_v32, 1024  ;;  %v222_v9 = vpop.permute.xlu0 %221  ;;  %v225_v39 = vpop.permute.xlu1 %224 }
  0xa1   : > { %vm405_vm2 = vcmp.lt.s32.totalorder %v404_v46, %v372_v42  ;;  %v377_v50 = vsel %vm256_vm9, %v1682_v11, %v345_v45  ;;  %v378_v51 = vsel %vm257_vm10, %v1691_v18, %v346_v47  ;;  %v379_v52 = vsel %vm258_vm11, %v1694_v19, %v347_v48 }
  0xa2   : > { %v1764_v53 = vsel %vm405_vm2, %v404_v46, %v372_v42  ;;  %v380_v54 = vsel %vm259_vm12, %v1697_v20, %v348_v49  ;;  %vm441_vm3 = vcmp.lt.s32.totalorder %v377_v50, %v378_v51  ;;  %vm252_vm4 = vcmp.eq.s32.totalorder %v213_v44, %v1699_v21 }
  0xa3   : > { %v408_v55 = vshra.s32 %v1764_v53, 16  ;;  %v442_v56 = vsel %vm441_vm3, %v377_v50, %v378_v51  ;;  %vm253_vm5 = vcmp.eq.s32.totalorder %v213_v44, %v1701_v22  ;;  %vm254_vm6 = vcmp.eq.s32.totalorder %v213_v44, %v1703_v23 }
  0xa4   : > { %vm443_vm7 = vcmp.lt.s32.totalorder %v442_v56, %v379_v52  ;;  %vm255_vm8 = vcmp.eq.s32.totalorder %v213_v44, %v1705_v24  ;;  %vm300_vm9 = vcmp.eq.s32.totalorder %v213_v44, %v1707_v25  ;;  %vm301_vm10 = vcmp.eq.s32.totalorder %v213_v44, %v1709_v26 }
  0xa5   : > { %v1776_v57 = vcvt.s32.f32 %v408_v55  ;;  %v444_v58 = vsel %vm443_vm7, %v442_v56, %v379_v52  ;;  %vm302_vm11 = vcmp.eq.s32.totalorder %v213_v44, %v1711_v27  ;;  %vm303_vm12 = vcmp.eq.s32.totalorder %v213_v44, %v1713_v28 }
  0xa6   : > { %vm445_vm13 = vcmp.lt.s32.totalorder %v444_v58, %v380_v54  ;;  %v341_v60 = vsel %vm300_vm9, %v1716_v29, 1024  ;;  %v342_v61 = vsel %vm301_vm10, %v1719_v30, 1024  ;;  %v343_v62 = vsel %vm302_vm11, %v1722_v31, 1024 }
  0xa7   : > { %411 = vmin.xlane.f32.xlu0 %v1776_v57  ;;  %v1784_v63 = vsel %vm445_vm13, %v444_v58, %v380_v54  ;;  %v344_v0 = vsel %vm303_vm12, %v1725_v32, 1024  ;;  %v373_v1 = vsel %vm252_vm4, %v1682_v11, %v341_v60  ;;  %v374_v2 = vsel %vm253_vm5, %v1691_v18, %v342_v61  ;;  %v228_v54 = vpop.permute.xlu0 %227 }
  0xa8   : > { %v448_v3 = vshra.s32 %v1784_v63, 16  ;;  %v375_v4 = vsel %vm254_vm6, %v1694_v19, %v343_v62  ;;  %v376_v5 = vsel %vm255_vm8, %v1697_v20, %v344_v0  ;;  %vm421_vm14 = vcmp.lt.s32.totalorder %v373_v1, %v374_v2 }
  0xa9   : > { %v422_v6 = vsel %vm421_vm14, %v373_v1, %v374_v2  ;;  %vm260_vm15 = vcmp.eq.s32.totalorder %v219_v59, %v1699_v21  ;;  %vm261_vm0 = vcmp.eq.s32.totalorder %v219_v59, %v1701_v22  ;;  %vm262_vm1 = vcmp.eq.s32.totalorder %v219_v59, %v1703_v23 }
  0xaa   : > { %v1803_v7 = vcvt.s32.f32 %v448_v3  ;;  %vm423_vm2 = vcmp.lt.s32.totalorder %v422_v6, %v375_v4  ;;  %vm263_vm3 = vcmp.eq.s32.totalorder %v219_v59, %v1705_v24  ;;  %vm308_vm4 = vcmp.eq.s32.totalorder %v219_v59, %v1707_v25 }
  0xab   : > { %v424_v8 = vsel %vm423_vm2, %v422_v6, %v375_v4  ;;  %vm309_vm5 = vcmp.eq.s32.totalorder %v219_v59, %v1709_v26  ;;  %vm310_vm6 = vcmp.eq.s32.totalorder %v219_v59, %v1711_v27  ;;  %vm311_vm7 = vcmp.eq.s32.totalorder %v219_v59, %v1713_v28  ;;  %v231_v6 = vpop.permute.xlu1 %230 }
  0xac   : > { %451 = vmin.xlane.f32.xlu0 %v1803_v7  ;;  %vm425_vm8 = vcmp.lt.s32.totalorder %v424_v8, %v376_v5  ;;  %v349_v10 = vsel %vm308_vm4, %v1716_v29, 1024  ;;  %v350_v12 = vsel %vm309_vm5, %v1719_v30, 1024  ;;  %v351_v13 = vsel %vm310_vm6, %v1722_v31, 1024 }
  0xad   : > { %v1814_v14 = vsel %vm425_vm8, %v424_v8, %v376_v5  ;;  %v352_v15 = vsel %vm311_vm7, %v1725_v32, 1024  ;;  %v381_v16 = vsel %vm260_vm15, %v1682_v11, %v349_v10  ;;  %v382_v17 = vsel %vm261_vm0, %v1691_v18, %v350_v12 }
  0xae   : > { %v428_v33 = vshra.s32 %v1814_v14, 16  ;;  %v383_v34 = vsel %vm262_vm1, %v1694_v19, %v351_v13  ;;  %v384_v35 = vsel %vm263_vm3, %v1697_v20, %v352_v15  ;;  %vm461_vm9 = vcmp.lt.s32.totalorder %v381_v16, %v382_v17 }
  0xaf   : > { %v462_v36 = vsel %vm461_vm9, %v381_v16, %v382_v17  ;;  %vm264_vm10 = vcmp.eq.s32.totalorder %v222_v9, %v1699_v21  ;;  %vm265_vm11 = vcmp.eq.s32.totalorder %v222_v9, %v1701_v22  ;;  %vm266_vm12 = vcmp.eq.s32.totalorder %v222_v9, %v1703_v23 }
  0xb0   : > { %v1833_v37 = vcvt.s32.f32 %v428_v33  ;;  %vm463_vm13 = vcmp.lt.s32.totalorder %v462_v36, %v383_v34  ;;  %vm267_vm14 = vcmp.eq.s32.totalorder %v222_v9, %v1705_v24  ;;  %vm312_vm15 = vcmp.eq.s32.totalorder %v222_v9, %v1707_v25 }
  0xb1   : > { %v464_v38 = vsel %vm463_vm13, %v462_v36, %v383_v34  ;;  %vm313_vm0 = vcmp.eq.s32.totalorder %v222_v9, %v1709_v26  ;;  %vm314_vm1 = vcmp.eq.s32.totalorder %v222_v9, %v1711_v27  ;;  %vm315_vm2 = vcmp.eq.s32.totalorder %v222_v9, %v1713_v28 }
  0xb2   : > { %431 = vmin.xlane.f32.xlu1 %v1833_v37  ;;  %vm465_vm3 = vcmp.lt.s32.totalorder %v464_v38, %v384_v35  ;;  %v353_v40 = vsel %vm312_vm15, %v1716_v29, 1024  ;;  %v354_v41 = vsel %vm313_vm0, %v1719_v30, 1024  ;;  %v355_v42 = vsel %vm314_vm1, %v1722_v31, 1024 }
  0xb3   : > { %v1844_v43 = vsel %vm465_vm3, %v464_v38, %v384_v35  ;;  %v356_v44 = vsel %vm315_vm2, %v1725_v32, 1024  ;;  %v385_v45 = vsel %vm264_vm10, %v1682_v11, %v353_v40  ;;  %v386_v46 = vsel %vm265_vm11, %v1691_v18, %v354_v41 }
  0xb4   : > { %v468_v47 = vshra.s32 %v1844_v43, 16  ;;  %v387_v48 = vsel %vm266_vm12, %v1694_v19, %v355_v42  ;;  %v388_v49 = vsel %vm267_vm14, %v1697_v20, %v356_v44  ;;  %vm481_vm4 = vcmp.lt.s32.totalorder %v385_v45, %v386_v46 }
  0xb5   : > { %v482_v50 = vsel %vm481_vm4, %v385_v45, %v386_v46  ;;  %vm268_vm5 = vcmp.eq.s32.totalorder %v225_v39, %v1699_v21  ;;  %vm269_vm6 = vcmp.eq.s32.totalorder %v225_v39, %v1701_v22  ;;  %vm270_vm7 = vcmp.eq.s32.totalorder %v225_v39, %v1703_v23 }
  0xb6   : > { %v1863_v51 = vcvt.s32.f32 %v468_v47  ;;  %vm483_vm8 = vcmp.lt.s32.totalorder %v482_v50, %v387_v48  ;;  %vm271_vm9 = vcmp.eq.s32.totalorder %v225_v39, %v1705_v24  ;;  %vm316_vm10 = vcmp.eq.s32.totalorder %v225_v39, %v1707_v25 }
  0xb7   : > { %v484_v52 = vsel %vm483_vm8, %v482_v50, %v387_v48  ;;  %vm317_vm11 = vcmp.eq.s32.totalorder %v225_v39, %v1709_v26  ;;  %vm318_vm12 = vcmp.eq.s32.totalorder %v225_v39, %v1711_v27  ;;  %vm319_vm13 = vcmp.eq.s32.totalorder %v225_v39, %v1713_v28 }
  0xb8   : > { %471 = vmin.xlane.f32.xlu0 %v1863_v51  ;;  %vm485_vm14 = vcmp.lt.s32.totalorder %v484_v52, %v388_v49  ;;  %v357_v55 = vsel %vm316_vm10, %v1716_v29, 1024  ;;  %v358_v56 = vsel %vm317_vm11, %v1719_v30, 1024  ;;  %v359_v58 = vsel %vm318_vm12, %v1722_v31, 1024 }
  0xb9   : > { %v1874_v59 = vsel %vm485_vm14, %v484_v52, %v388_v49  ;;  %v360_v60 = vsel %vm319_vm13, %v1725_v32, 1024  ;;  %v389_v61 = vsel %vm268_vm5, %v1682_v11, %v357_v55  ;;  %v390_v62 = vsel %vm269_vm6, %v1691_v18, %v358_v56 }
  0xba   : > { %v488_v0 = vshra.s32 %v1874_v59, 16  ;;  %v391_v1 = vsel %vm270_vm7, %v1694_v19, %v359_v58  ;;  %v392_v2 = vsel %vm271_vm9, %v1697_v20, %v360_v60  ;;  %vm501_vm15 = vcmp.lt.s32.totalorder %v389_v61, %v390_v62 }
  0xbb   : > { %v502_v3 = vsel %vm501_vm15, %v389_v61, %v390_v62  ;;  %vm272_vm0 = vcmp.eq.s32.totalorder %v228_v54, %v1699_v21  ;;  %vm273_vm1 = vcmp.eq.s32.totalorder %v228_v54, %v1701_v22  ;;  %vm274_vm2 = vcmp.eq.s32.totalorder %v228_v54, %v1703_v23 }
  0xbc   : > { %v1893_v4 = vcvt.s32.f32 %v488_v0  ;;  %vm503_vm3 = vcmp.lt.s32.totalorder %v502_v3, %v391_v1  ;;  %vm275_vm4 = vcmp.eq.s32.totalorder %v228_v54, %v1705_v24  ;;  %vm320_vm5 = vcmp.eq.s32.totalorder %v228_v54, %v1707_v25 }
  0xbd   : > { %v504_v5 = vsel %vm503_vm3, %v502_v3, %v391_v1  ;;  %vm321_vm6 = vcmp.eq.s32.totalorder %v228_v54, %v1709_v26  ;;  %vm322_vm7 = vcmp.eq.s32.totalorder %v228_v54, %v1711_v27  ;;  %vm323_vm8 = vcmp.eq.s32.totalorder %v228_v54, %v1713_v28 }
  0xbe   : > { %491 = vmin.xlane.f32.xlu1 %v1893_v4  ;;  %vm505_vm9 = vcmp.lt.s32.totalorder %v504_v5, %v392_v2  ;;  %v361_v8 = vsel %vm320_vm5, %v1716_v29, 1024  ;;  %v362_v9 = vsel %vm321_vm6, %v1719_v30, 1024  ;;  %v363_v10 = vsel %vm322_vm7, %v1722_v31, 1024 }
  0xbf   : > { %v1904_v12 = vsel %vm505_vm9, %v504_v5, %v392_v2  ;;  %v364_v13 = vsel %vm323_vm8, %v1725_v32, 1024  ;;  %v393_v15 = vsel %vm272_vm0, %v1682_v11, %v361_v8  ;;  %v394_v16 = vsel %vm273_vm1, %v1691_v18, %v362_v9  ;;  %v977_v9 = vld [vmem:[%s2560_s3 + $0x80] sm:$0xff] }
  0xc0   : > { %v508_v17 = vshra.s32 %v1904_v12, 16  ;;  %v395_v33 = vsel %vm274_vm2, %v1694_v19, %v363_v10  ;;  %vm521_vm10 = vcmp.lt.s32.totalorder %v393_v15, %v394_v16  ;;  %v396_v34 = vsel %vm275_vm4, %v1697_v20, %v364_v13  ;;  %v978_v10 = vld [vmem:[%s2560_s3 + $0x88] sm:$0xff] }
  0xc1   : > { %v522_v35 = vsel %vm521_vm10, %v393_v15, %v394_v16  ;;  %vm276_vm11 = vcmp.eq.s32.totalorder %v231_v6, %v1699_v21  ;;  %vm277_vm12 = vcmp.eq.s32.totalorder %v231_v6, %v1701_v22  ;;  %vm278_vm14 = vcmp.eq.s32.totalorder %v231_v6, %v1703_v23  ;;  %v1010_v15 = vld [vmem:[%s2560_s3 + $0x188] sm:$0xff]  ;;  %v961_v16 = vld [vmem:[%s2560_s3] sm:$0xff] }
  0xc2   : > { %v1922_v36 = vcvt.s32.f32 %v508_v17  ;;  %vm523_vm13 = vcmp.lt.s32.totalorder %v522_v35, %v395_v33  ;;  %vm324_vm15 = vcmp.eq.s32.totalorder %v231_v6, %v1707_v25  ;;  %vm325_vm0 = vcmp.eq.s32.totalorder %v231_v6, %v1709_v26  ;;  %v962_v17 = vld [vmem:[%s2560_s3 + $0x8] sm:$0xff] }
  0xc3   : > { %v524_v38 = vsel %vm523_vm13, %v522_v35, %v395_v33  ;;  %vm326_vm1 = vcmp.eq.s32.totalorder %v231_v6, %v1711_v27  ;;  %vm327_vm2 = vcmp.eq.s32.totalorder %v231_v6, %v1713_v28  ;;  %v365_v39 = vsel %vm324_vm15, %v1716_v29, 1024  ;;  %v993_v35 = vld [vmem:[%s2560_s3 + $0x100] sm:$0xff] }
  0xc4   : > { %511 = vmin.xlane.f32.xlu0 %v1922_v36  ;;  %vm525_vm3 = vcmp.lt.s32.totalorder %v524_v38, %v396_v34  ;;  %v366_v40 = vsel %vm325_vm0, %v1719_v30, 1024  ;;  %v367_v41 = vsel %vm326_vm1, %v1722_v31, 1024  ;;  %v397_v25 = vsel %vm276_vm11, %v1682_v11, %v365_v39  ;;  %v979_v39 = vld [vmem:[%s2560_s3 + $0x90] sm:$0xff] }
  0xc5   : > { %v526_v42 = vsel %vm525_vm3, %v524_v38, %v396_v34  ;;  %v398_v26 = vsel %vm277_vm12, %v1691_v18, %v366_v40  ;;  %vm279_vm4 = vcmp.eq.s32.totalorder %v231_v6, %v1705_v24  ;;  %v368_v28 = vsel %vm327_vm2, %v1725_v32, 1024  ;;  %v980_v40 = vld [vmem:[%s2560_s3 + $0x98] sm:$0xff] }
  0xc6   : > { %v528_v27 = vshra.s32 %v526_v42, 16  ;;  %vm541_vm5 = vcmp.lt.s32.totalorder %v397_v25, %v398_v26  ;;  %v399_v29 = vsel %vm278_vm14, %v1694_v19, %v367_v41  ;;  %v400_v21 = vsel %vm279_vm4, %v1697_v20, %v368_v28  ;;  %v1011_v41 = vld [vmem:[%s2560_s3 + $0x190] sm:$0xff] }
  0xc7   : > { %v542_v30 = vsel %vm541_vm5, %v397_v25, %v398_v26  ;;  %v407_v24 = vand.u32 65535, %v1764_v53  ;;  %v447_v23 = vand.u32 65535, %v1784_v63  ;;  %v427_v52 = vand.u32 65535, %v1814_v14  ;;  %v1012_v25 = vld [vmem:[%s2560_s3 + $0x198] sm:$0xff]  ;;  %v963_v26 = vld [vmem:[%s2560_s3 + $0x10] sm:$0xff] }
  0xc8   : > { %v530_v31 = vcvt.s32.f32 %v528_v27  ;;  %vm543_vm6 = vcmp.lt.s32.totalorder %v542_v30, %v399_v29  ;;  %v467_v63 = vand.u32 65535, %v1844_v43  ;;  %v507_v43 = vand.u32 65535, %v1904_v12  ;;  %v1009_v12 = vld [vmem:[%s2560_s3 + $0x180] sm:$0xff]  ;;  %v964_v27 = vld [vmem:[%s2560_s3 + $0x18] sm:$0xff] }
  0xc9   : > { %v544_v44 = vsel %vm543_vm6, %v542_v30, %v399_v29  ;;  %v409_v47 = vcvt.s32.f32 %v407_v24  ;;  %v449_v50 = vcvt.s32.f32 %v447_v23  ;;  %v429_v55 = vcvt.s32.f32 %v427_v52  ;;  %v995_v30 = vld [vmem:[%s2560_s3 + $0x110] sm:$0xff]  ;;  %v1014_v24 = vld [vmem:[%s2560_s3 + $0x1a8] sm:$0xff]  ;;  %v997_v52 = vld [vmem:[%s2560_s3 + $0x120] sm:$0xff] }
  0xca   : > { %531 = vmin.xlane.f32.xlu1 %v530_v31  ;;  %vm545_vm7 = vcmp.lt.s32.totalorder %v544_v44, %v400_v21  ;;  %v469_v58 = vcvt.s32.f32 %v467_v63  ;;  %v509_v0 = vcvt.s32.f32 %v507_v43  ;;  %v1431_v13 = vpack.c.bf16 %v978_v10, %v977_v9  ;;  %v966_v23 = vld [vmem:[%s2560_s3 + $0x28] sm:$0xff]  ;;  %v984_v63 = vld [vmem:[%s2560_s3 + $0xb8] sm:$0xff]  ;;  %v969_v10 = vld [vmem:[%s2560_s3 + $0x40] sm:$0xff] }
  0xcb   : > { %v546_v22 = vsel %vm545_vm7, %v544_v44, %v400_v21  ;;  %v1463_v33 = vpack.c.bf16 %v1010_v15, %v1009_v12  ;;  %v1433_v34 = vpack.c.bf16 %v962_v17, %v961_v16  ;;  %v1467_v28 = vpack.c.bf16 %v1012_v25, %v1011_v41  ;;  %v981_v44 = vld [vmem:[%s2560_s3 + $0xa0] sm:$0xff]  ;;  %v968_v43 = vld [vmem:[%s2560_s3 + $0x38] sm:$0xff]  ;;  %v1018_v9 = vld [vmem:[%s2560_s3 + $0x1c8] sm:$0xff] }
  0xcc   : > { %v548_v45 = vshra.s32 %v546_v22, 16  ;;  %1432 = vmatprep.subr.bf16.mxu0 %v1431_v13  ;;  %v1437_v29 = vpack.c.bf16 %v964_v27, %v963_v26  ;;  %v970_v13 = vld [vmem:[%s2560_s3 + $0x48] sm:$0xff]  ;;  %v1001_v15 = vld [vmem:[%s2560_s3 + $0x140] sm:$0xff]  ;;  %v972_v41 = vld [vmem:[%s2560_s3 + $0x58] sm:$0xff] }
  0xcd   : > { %1464 = vmatprep.subr.bf16.mxu1 %v1463_v33  ;;  %1434 = vmatpush3.bf16.msra.mxu0 %v1433_v34  ;;  %v1002_v16 = vld [vmem:[%s2560_s3 + $0x148] sm:$0xff]  ;;  %v1449_v17 = vpack.c.bf16 %v970_v13, %v969_v10  ;;  %v987_v33 = vld [vmem:[%s2560_s3 + $0xd0] sm:$0xff]  ;;  %v988_v34 = vld [vmem:[%s2560_s3 + $0xd8] sm:$0xff] }
  0xce   : > { %v550_v46 = vcvt.s32.f32 %v548_v45  ;;  %v1013_v45 = vld [vmem:[%s2560_s3 + $0x1a0] sm:$0xff]  ;;  %v1003_v25 = vld [vmem:[%s2560_s3 + $0x150] sm:$0xff]  ;;  %v1004_v26 = vld [vmem:[%s2560_s3 + $0x158] sm:$0xff] }
  0xcf   : > { %v989_v27 = vld [vmem:[%s2560_s3 + $0xe0] sm:$0xff] }
  0xd0   : > { %551 = vmin.xlane.f32.xlu0 %v550_v46 }
 0x134   : > { %v1946_v32 = vpop.xlane.xlu0 %411 }
 0x135   : > { %vm413_vm8 = vcmp.eq.f32.partialorder %v1776_v57, %v1946_v32 }
 0x136   : > { %v414_v48 = vsel %vm413_vm8, %v409_v47, inf  ;;  %v965_v47 = vld [vmem:[%s2560_s3 + $0x20] sm:$0xff] }
 0x137   : > { %415 = vmin.xlane.f32.xlu1 %v414_v48  ;;  %v1471_v48 = vpack.c.bf16 %v1014_v24, %v1013_v45  ;;  %v974_v45 = vld [vmem:[%s2560_s3 + $0x68] sm:$0xff] }
 0x139   : > { %v1951_v49 = vpop.xlane.xlu0 %451 }
 0x13a   : > { %vm453_vm9 = vcmp.eq.f32.partialorder %v1803_v7, %v1951_v49  ;;  %v487_v7 = vand.u32 65535, %v1874_v59 }
 0x13b   : > { %v454_v54 = vsel %vm453_vm9, %v449_v50, inf  ;;  %v1441_v50 = vpack.c.bf16 %v966_v23, %v965_v47  ;;  %v1006_v47 = vld [vmem:[%s2560_s3 + $0x168] sm:$0xff]  ;;  %v991_v23 = vld [vmem:[%s2560_s3 + $0xf0] sm:$0xff] }
 0x13c   : > { %455 = vmin.xlane.f32.xlu1 %v454_v54  ;;  %v489_v61 = vcvt.s32.f32 %v487_v7  ;;  %v998_v54 = vld [vmem:[%s2560_s3 + $0x128] sm:$0xff]  ;;  %v1016_v7 = vld [vmem:[%s2560_s3 + $0x1b8] sm:$0xff] }
 0x13f   : > { %v1956_v53 = vpop.xlane.xlu1 %431 }
 0x140   : > { %vm433_vm10 = vcmp.eq.f32.partialorder %v1833_v37, %v1956_v53 }
 0x141   : > { %v434_v57 = vsel %vm433_vm10, %v429_v55, inf  ;;  %v983_v55 = vld [vmem:[%s2560_s3 + $0xb0] sm:$0xff] }
 0x142   : > { %435 = vmin.xlane.f32.xlu0 %v434_v57  ;;  %v1473_v57 = vpack.c.bf16 %v998_v54, %v997_v52  ;;  %v1024_v52 = vld [vmem:[%s2560_s3 + $0x1f8] sm:$0xff] }
 0x145   : > { %v1961_v56 = vpop.xlane.xlu0 %471 }
 0x146   : > { %vm473_vm11 = vcmp.eq.f32.partialorder %v1863_v51, %v1961_v56  ;;  %v527_v51 = vand.u32 65535, %v526_v42  ;;  %v1435_v42 = vpack.c.bf16 %v980_v40, %v979_v39  ;;  %v1020_v39 = vld [vmem:[%s2560_s3 + $0x1d8] sm:$0xff]  ;;  %v971_v40 = vld [vmem:[%s2560_s3 + $0x50] sm:$0xff] }
 0x147   : > { %v474_v14 = vsel %vm473_vm11, %v469_v58, inf  ;;  %v1015_v58 = vld [vmem:[%s2560_s3 + $0x1b0] sm:$0xff] }
 0x148   : > { %475 = vmin.xlane.f32.xlu0 %v474_v14  ;;  %v529_v2 = vcvt.s32.f32 %v527_v51  ;;  %1436 = vmatprep.subr.bf16.mxu0 %v1435_v42  ;;  %v1443_v14 = vpack.c.bf16 %v984_v63, %v983_v55  ;;  %v975_v63 = vld [vmem:[%s2560_s3 + $0x70] sm:$0xff] }
 0x149   : > { %1438 = vmatpush3.bf16.msra.mxu0 %v1437_v29  ;;  %v1021_v29 = vld [vmem:[%s2560_s3 + $0x1e0] sm:$0xff] }
 0x14b   : > { %v1966_v60 = vpop.xlane.xlu1 %491 }
 0x14c   : > { %vm493_vm12 = vcmp.eq.f32.partialorder %v1893_v4, %v1966_v60  ;;  %v547_v4 = vand.u32 65535, %v546_v22  ;;  %v982_v22 = vld [vmem:[%s2560_s3 + $0xa8] sm:$0xff] }
 0x14d   : > { %v494_v37 = vsel %vm493_vm12, %v489_v61, inf  ;;  %v1475_v61 = vpack.c.bf16 %v1016_v7, %v1015_v58  ;;  %v976_v58 = vld [vmem:[%s2560_s3 + $0x78] sm:$0xff] }
 0x14e   : > { %495 = vmin.xlane.f32.xlu1 %v494_v37  ;;  %v549_v6 = vcvt.s32.f32 %v547_v4  ;;  %v967_v37 = vld [vmem:[%s2560_s3 + $0x30] sm:$0xff] }
 0x14f   : > { %v1445_v51 = vpack.c.bf16 %v968_v43, %v967_v37  ;;  %v1461_v37 = vpack.c.bf16 %v976_v58, %v975_v63 }
 0x151   : > { %v1971_v62 = vpop.xlane.xlu0 %511 }
 0x152   : > { %vm513_vm13 = vcmp.eq.f32.partialorder %v1922_v36, %v1971_v62  ;;  %v994_v36 = vld [vmem:[%s2560_s3 + $0x108] sm:$0xff]  ;;  %v518_v13 = vcvt.f32.s32 %v1971_v62 }
 0x153   : > { %v514_v59 = vsel %vm513_vm13, %v509_v0, inf  ;;  %v1465_v38 = vpack.c.bf16 %v994_v36, %v993_v35  ;;  %v999_v0 = vld [vmem:[%s2560_s3 + $0x130] sm:$0xff]  ;;  %v1481_v36 = vpack.c.bf16 %v1002_v16, %v1001_v15 }
 0x154   : > { %515 = vmin.xlane.f32.xlu0 %v514_v59  ;;  %v1000_v59 = vld [vmem:[%s2560_s3 + $0x138] sm:$0xff]  ;;  %v1019_v35 = vld [vmem:[%s2560_s3 + $0x1d0] sm:$0xff] }
 0x155   : > { %1466 = vmatpush3.bf16.msra.mxu1 %v1465_v38  ;;  %v1477_v4 = vpack.c.bf16 %v1000_v59, %v999_v0  ;;  %v1451_v38 = vpack.c.bf16 %v988_v34, %v987_v33  ;;  %v1483_v42 = vpack.c.bf16 %v1020_v39, %v1019_v35  ;;  %v418_v0 = vcvt.f32.s32 %v1946_v32 }
 0x156   : > { %1468 = vmatprep.subr.bf16.mxu1 %v1467_v28  ;;  %v990_v28 = vld [vmem:[%s2560_s3 + $0xe8] sm:$0xff]  ;;  %v1603_v33 = vmov 0.0  }
 0x157   : > { %v1975_v1 = vpop.xlane.xlu1 %531  ;;  %v419_v59 = vshll.u32 %v418_v0, 16 }
 0x158   : > { %vm533_vm14 = vcmp.eq.f32.partialorder %v530_v31, %v1975_v1  ;;  %v996_v31 = vld [vmem:[%s2560_s3 + $0x118] sm:$0xff]  ;;  %v538_v62 = vcvt.f32.s32 %v1975_v1 }
 0x159   : > { %v534_v3 = vsel %vm533_vm14, %v529_v2, inf  ;;  %v1469_v21 = vpack.c.bf16 %v996_v31, %v995_v30  ;;  %v985_v2 = vld [vmem:[%s2560_s3 + $0xc0] sm:$0xff]  ;;  %v1022_v30 = vld [vmem:[%s2560_s3 + $0x1e8] sm:$0xff]  ;;  %v1453_v31 = vpack.c.bf16 %v972_v41, %v971_v40 }
 0x15a   : > { %535 = vmin.xlane.f32.xlu1 %v534_v3  ;;  %v986_v3 = vld [vmem:[%s2560_s3 + $0xc8] sm:$0xff]  ;;  %v1487_v24 = vpack.c.bf16 %v1022_v30, %v1021_v29 }
 0x15b   : > { %1470 = vmatpush3.bf16.msra.mxu1 %v1469_v21  ;;  %v1485_v21 = vpack.c.bf16 %v1004_v26, %v1003_v25 }
 0x15c   : > { %1472 = vmatprep.subr.bf16.mxu1 %v1471_v48  ;;  %v992_v48 = vld [vmem:[%s2560_s3 + $0xf8] sm:$0xff] }
 0x15d   : > { %v1978_v5 = vpop.xlane.xlu0 %551 }
 0x15e   : > { %vm553_vm15 = vcmp.eq.f32.partialorder %v550_v46, %v1978_v5  ;;  %v1439_v46 = vpack.c.bf16 %v982_v22, %v981_v44  ;;  %v1455_v44 = vpack.c.bf16 %v990_v28, %v989_v27  ;;  %v973_v22 = vld [vmem:[%s2560_s3 + $0x60] sm:$0xff]  ;;  %v558_v35 = vcvt.f32.s32 %v1978_v5 }
 0x15f   : > { %v554_v8 = vsel %vm553_vm15, %v549_v6, inf  ;;  %1474 = vmatpush3.bf16.msra.mxu1 %v1473_v57  ;;  %v1447_v6 = vpack.c.bf16 %v986_v3, %v985_v2  ;;  %v1457_v54 = vpack.c.bf16 %v974_v45, %v973_v22  ;;  %v1459_v57 = vpack.c.bf16 %v992_v48, %v991_v23 }
 0x160   : > { %555 = vmin.xlane.f32.xlu0 %v554_v8  ;;  %1440 = vmatprep.subr.bf16.mxu0 %v1439_v46  ;;  %v1017_v8 = vld [vmem:[%s2560_s3 + $0x1c0] sm:$0xff]  ;;  %v458_v3 = vcvt.f32.s32 %v1951_v49  ;;  %v2208_v45 = vshll.u32 %v538_v62, 16 }
 0x161   : > { %1442 = vmatpush3.bf16.msra.mxu0 %v1441_v50  ;;  %1476 = vmatprep.subr.bf16.mxu1 %v1475_v61  ;;  %v1479_v12 = vpack.c.bf16 %v1018_v9, %v1017_v8  ;;  %v1005_v46 = vld [vmem:[%s2560_s3 + $0x160] sm:$0xff]  ;;  %v1023_v50 = vld [vmem:[%s2560_s3 + $0x1f0] sm:$0xff]  ;;  %v1008_v61 = vld [vmem:[%s2560_s3 + $0x178] sm:$0xff]  ;;  %v478_v8 = vcvt.f32.s32 %v1961_v56 }
 0x162   : > { %1444 = vmatprep.subr.bf16.mxu0 %v1443_v14  ;;  %v1489_v55 = vpack.c.bf16 %v1006_v47, %v1005_v46  ;;  %v1491_v7 = vpack.c.bf16 %v1024_v52, %v1023_v50  ;;  %v1007_v14 = vld [vmem:[%s2560_s3 + $0x170] sm:$0xff]  ;;  %v459_v16 = vshll.u32 %v458_v3, 16  ;;  %v2210_v46 = vshll.u32 %v558_v35, 16 }
 0x163   : > { %1478 = vmatpush3.bf16.msra.mxu1 %v1477_v4  ;;  %v1493_v43 = vpack.c.bf16 %v1008_v61, %v1007_v14 }
 0x164   : > { %1480 = vmatprep.subr.bf16.mxu1 %v1479_v12  ;;  %v498_v12 = vcvt.f32.s32 %v1966_v60 }
 0x165   : > { %1446 = vmatpush3.bf16.msra.mxu0 %v1445_v51 }
 0x166   : > { %1448 = vmatprep.subr.bf16.mxu0 %v1447_v6  ;;  %v438_v6 = vcvt.f32.s32 %v1956_v53  ;;  %v2182_v53 = vshll.u32 %v478_v8, 16  ;;  %v2186_v60 = vshll.u32 %v498_v12, 16 }
 0x167   : > { %1482 = vmatpush3.bf16.msra.mxu1 %v1481_v36 }
 0x168   : > { %1484 = vmatprep.subr.bf16.mxu1 %v1483_v42  ;;  %v439_v49 = vshll.u32 %v438_v6, 16 }
 0x169   : > { %1450 = vmatpush3.bf16.msra.mxu0 %v1449_v17  ;;  %v2189_v17 = vshll.u32 %v518_v13, 16 }
 0x16a   : > { %1452 = vmatprep.subr.bf16.mxu0 %v1451_v38 }
 0x16b   : > { %1486 = vmatpush3.bf16.msra.mxu1 %v1485_v21 }
 0x16c   : > { %1488 = vmatprep.subr.bf16.mxu1 %v1487_v24 }
 0x16d   : > { %1454 = vmatpush3.bf16.msra.mxu0 %v1453_v31 }
 0x16e   : > { %1456 = vmatprep.subr.bf16.mxu0 %v1455_v44 }
 0x16f   : > { %1490 = vmatpush3.bf16.msra.mxu1 %v1489_v55 }
 0x170   : > { %1492 = vmatprep.subr.bf16.mxu1 %v1491_v7 }
 0x171   : > { %1458 = vmatpush3.bf16.msra.mxu0 %v1457_v54 }
 0x172   : > { %1460 = vmatprep.subr.bf16.mxu0 %v1459_v57 }
 0x173   : > { %1494 = vmatpush3.bf16.msra.mxu1 %v1493_v43 }
 0x175   : > { %1462 = vmatpush3.bf16.msra.mxu0 %v1461_v37 }
 0x1c4   : > { %v416_v51 = vpop.xlane.xlu1 %415 }
 0x1c5   : > { %v417_v2 = vcvt.f32.s32 %v416_v51 }
 0x1c7   : > { %v420_v4 = vadd.s32 %v419_v59, %v417_v2 }
 0x1c9   : > { %vm569_vm0 = vcmp.ge.s32.totalorder %v420_v4, 512  ;;  %v1317_v9 = vadd.s32 4294966784, %v420_v4  ;;  %v456_v10 = vpop.xlane.xlu1 %455  ;;  %vm561_vm1 = vcmp.lt.s32.totalorder %v420_v4, 1024 }
 0x1ca   : > { %v457_v15 = vcvt.f32.s32 %v456_v10 }
 0x1cb   : > { %v585_v32 = vsel %vm569_vm0, %v1317_v9, %v420_v4 }
 0x1cc   : > { %vm593_vm2 = vcmp.eq.s32.totalorder %v1682_v11, %v585_v32  ;;  %vm594_vm3 = vcmp.eq.s32.totalorder %v1691_v18, %v585_v32  ;;  %vm595_vm4 = vcmp.eq.s32.totalorder %v1694_v19, %v585_v32  ;;  %vm596_vm5 = vcmp.eq.s32.totalorder %v1697_v20, %v585_v32 }
 0x1cd   : > { %vm641_vm6 = vmand %vm593_vm2, %vm561_vm1  ;;  %v460_v56 = vadd.s32 %v459_v16, %v457_v15 }
 0x1ce   : > { %vm642_vm7 = vmand %vm594_vm3, %vm561_vm1  ;;  %v1325_v34 = vsel %vm641_vm6, 1.0, %v1603_v33 }
 0x1cf   : > { %vm643_vm8 = vmand %vm595_vm4, %vm561_vm1  ;;  %v1326_v36 = vsel %vm642_vm7, 1.0, %v1603_v33  ;;  %v737_v38 = vrot.slane %v1325_v34, 4  ;;  %vm571_vm9 = vcmp.ge.s32.totalorder %v460_v56, 512  ;;  %v436_v39 = vpop.xlane.xlu0 %435  ;;  %v1319_v41 = vadd.s32 4294966784, %v460_v56 }
 0x1d0   : > { %vm644_vm10 = vmand %vm596_vm5, %vm561_vm1  ;;  %v1327_v1 = vsel %vm643_vm8, 1.0, %v1603_v33  ;;  %v743_v40 = vrot.slane %v1326_v36, 4  ;;  %v437_v42 = vcvt.f32.s32 %v436_v39  ;;  %vm563_vm11 = vcmp.lt.s32.totalorder %v460_v56, 1024 }
 0x1d1   : > { %v1328_v25 = vsel %vm644_vm10, 1.0, %v1603_v33  ;;  %v738_v26 = vadd.f32 %v1325_v34, %v737_v38  ;;  %v749_v5 = vrot.slane %v1327_v1, 4  ;;  %v587_v29 = vsel %vm571_vm9, %v1319_v41, %v460_v56 }
 0x1d2   : > { %v744_v27 = vadd.f32 %v1326_v36, %v743_v40  ;;  %v755_v28 = vrot.slane %v1328_v25, 4  ;;  %v2201_v30 = vadd.s32 %v439_v49, %v437_v42  ;;  %vm601_vm12 = vcmp.eq.s32.totalorder %v1682_v11, %v587_v29 }
 0x1d3   : > { %v739_v31 = vrot.slane %v738_v26, 2  ;;  %v750_v21 = vadd.f32 %v1327_v1, %v749_v5  ;;  %vm602_vm13 = vcmp.eq.s32.totalorder %v1691_v18, %v587_v29  ;;  %vm603_vm14 = vcmp.eq.s32.totalorder %v1694_v19, %v587_v29  ;;  %vm649_vm0 = vmand %vm601_vm12, %vm563_vm11 }
 0x1d4   : > { %v745_v44 = vrot.slane %v744_v27, 2  ;;  %v756_v22 = vadd.f32 %v1328_v25, %v755_v28  ;;  %vm604_vm15 = vcmp.eq.s32.totalorder %v1697_v20, %v587_v29  ;;  %vm650_vm1 = vmand %vm602_vm13, %vm563_vm11  ;;  %v1333_v47 = vsel %vm649_vm0, 1.0, %v1603_v33 }
 0x1d5   : > { %v751_v24 = vrot.slane %v750_v21, 2  ;;  %v2214_v23 = vadd.f32 %v739_v31, %v738_v26  ;;  %vm651_vm2 = vmand %vm603_vm14, %vm563_vm11  ;;  %v1334_v50 = vsel %vm650_vm1, 1.0, %v1603_v33  ;;  %v785_v52 = vrot.slane %v1333_v47, 4  ;;  %v476_v58 = vpop.xlane.xlu0 %475 }
 0x1d6   : > { %v757_v48 = vrot.slane %v756_v22, 2  ;;  %v746_v54 = vadd.f32 %v745_v44, %v744_v27  ;;  %vm652_vm3 = vmand %vm604_vm15, %vm563_vm11  ;;  %v1335_v57 = vsel %vm651_vm2, 1.0, %v1603_v33  ;;  %v791_v63 = vrot.slane %v1334_v50, 4 }
 0x1d7   : > { %v2218_v55 = vadd.f32 %v751_v24, %v750_v21  ;;  %v1336_v7 = vsel %vm652_vm3, 1.0, %v1603_v33  ;;  %v786_v14 = vadd.f32 %v1333_v47, %v785_v52  ;;  %v797_v61 = vrot.slane %v1335_v57, 4 }
 0x1d8   : > { %vm562_vm4 = vcmp.lt.s32.totalorder %v2201_v30, 1024  ;;  %v758_v37 = vadd.f32 %v757_v48, %v756_v22  ;;  %v792_v43 = vadd.f32 %v1334_v50, %v791_v63  ;;  %v803_v0 = vrot.slane %v1336_v7, 4 }
 0x1d9   : > { %vm570_vm5 = vcmp.ge.s32.totalorder %v2201_v30, 512  ;;  %v787_v51 = vrot.slane %v786_v14, 2  ;;  %v798_v59 = vadd.f32 %v1335_v57, %v797_v61  ;;  %v1318_v2 = vadd.s32 4294966784, %v2201_v30 }
 0x1da   : > { %v477_v3 = vcvt.f32.s32 %v476_v58  ;;  %v741_v4 = vrot.slane %v2214_v23, 1  ;;  %v753_v6 = vrot.slane %v2218_v55, 1  ;;  %v2228_v8 = vadd.f32 %v1336_v7, %v803_v0 }
 0x1db   : > { %v496_v9 = vpop.xlane.xlu1 %495  ;;  %v747_v10 = vrot.slane %v746_v54, 1  ;;  %v793_v12 = vrot.slane %v792_v43, 2  ;;  %v799_v13 = vrot.slane %v798_v59, 2  ;;  %v586_v15 = vsel %vm570_vm5, %v1318_v2, %v2201_v30 }
 0x1dc   : > { %v497_v16 = vcvt.f32.s32 %v496_v9  ;;  %vm597_vm6 = vcmp.eq.s32.totalorder %v1682_v11, %v586_v15  ;;  %vm598_vm7 = vcmp.eq.s32.totalorder %v1691_v18, %v586_v15  ;;  %vm599_vm8 = vcmp.eq.s32.totalorder %v1694_v19, %v586_v15 }
 0x1dd   : > { %v759_v32 = vrot.slane %v758_v37, 1  ;;  %v2234_v49 = vadd.f32 %v787_v51, %v786_v14  ;;  %vm600_vm9 = vcmp.eq.s32.totalorder %v1697_v20, %v586_v15  ;;  %vm645_vm10 = vmand %vm597_vm6, %vm562_vm4  ;;  %v2241_v62 = vadd.s32 %v2182_v53, %v477_v3 }
 0x1de   : > { %v500_v56 = vadd.s32 %v2186_v60, %v497_v16  ;;  %v2243_v34 = vadd.f32 %v799_v13, %v798_v59  ;;  %v805_v35 = vrot.slane %v2228_v8, 2  ;;  %vm646_vm11 = vmand %vm598_vm7, %vm562_vm4  ;;  %v1329_v36 = vsel %vm645_vm10, 1.0, %v1603_v33 }
 0x1df   : > { %v2249_v38 = vadd.f32 %v747_v10, %v746_v54  ;;  %vm647_vm12 = vmand %vm599_vm8, %vm562_vm4  ;;  %v1330_v39 = vsel %vm646_vm11, 1.0, %v1603_v33  ;;  %v761_v60 = vrot.slane %v1329_v36, 4  ;;  %v2254_v53 = vadd.f32 %v793_v12, %v792_v43 }
 0x1e0   : > { %vm573_vm13 = vcmp.ge.s32.totalorder %v500_v56, 512  ;;  %vm648_vm14 = vmand %vm600_vm9, %vm562_vm4  ;;  %v1331_v1 = vsel %vm647_vm12, 1.0, %v1603_v33  ;;  %v767_v40 = vrot.slane %v1330_v39, 4  ;;  %vm565_vm15 = vcmp.lt.s32.totalorder %v500_v56, 1024 }
 0x1e1   : > { %v1321_v41 = vadd.s32 4294966784, %v500_v56  ;;  %v1332_v42 = vsel %vm648_vm14, 1.0, %v1603_v33  ;;  %v762_v25 = vadd.f32 %v1329_v36, %v761_v60  ;;  %v773_v26 = vrot.slane %v1331_v1, 4  ;;  %v516_v63 = vpop.xlane.xlu0 %515 }
 0x1e2   : > { %vm572_vm0 = vcmp.ge.s32.totalorder %v2241_v62, 512  ;;  %v768_v5 = vadd.f32 %v1330_v39, %v767_v40  ;;  %v779_v27 = vrot.slane %v1332_v42, 4  ;;  %v1320_v29 = vadd.s32 4294966784, %v2241_v62 }
 0x1e3   : > { %v589_v28 = vsel %vm573_vm13, %v1321_v41, %v500_v56  ;;  %v763_v31 = vrot.slane %v762_v25, 2  ;;  %v774_v21 = vadd.f32 %v1331_v1, %v773_v26  ;;  %v2271_v48 = vadd.f32 %v759_v32, %v758_v37 }
 0x1e4   : > { %vm609_vm1 = vcmp.eq.s32.totalorder %v1682_v11, %v589_v28  ;;  %vm610_vm2 = vcmp.eq.s32.totalorder %v1691_v18, %v589_v28  ;;  %v769_v30 = vrot.slane %v768_v5, 2  ;;  %v780_v44 = vadd.f32 %v1332_v42, %v779_v27 }
 0x1e5   : > { %vm611_vm3 = vcmp.eq.s32.totalorder %v1694_v19, %v589_v28  ;;  %vm612_vm4 = vcmp.eq.s32.totalorder %v1697_v20, %v589_v28  ;;  %vm657_vm5 = vmand %vm609_vm1, %vm565_vm15  ;;  %v2267_v22 = vadd.f32 %v763_v31, %v762_v25  ;;  %v775_v24 = vrot.slane %v774_v21, 2 }
 0x1e6   : > { %vm658_vm6 = vmand %vm610_vm2, %vm565_vm15  ;;  %v1341_v47 = vsel %vm657_vm5, 1.0, %v1603_v33  ;;  %v781_v50 = vrot.slane %v780_v44, 2  ;;  %v588_v57 = vsel %vm572_vm0, %v1320_v29, %v2241_v62  ;;  %v2278_v58 = vadd.f32 %v769_v30, %v768_v5 }
 0x1e7   : > { %vm659_vm7 = vmand %vm611_vm3, %vm565_vm15  ;;  %v1342_v52 = vsel %vm658_vm6, 1.0, %v1603_v33  ;;  %v833_v54 = vrot.slane %v1341_v47, 4  ;;  %v2280_v7 = vadd.f32 %v775_v24, %v774_v21  ;;  %vm564_vm9 = vcmp.lt.s32.totalorder %v2241_v62, 1024  ;;  %v536_v61 = vpop.xlane.xlu1 %535 }
 0x1e8   : > { %vm660_vm8 = vmand %vm612_vm4, %vm565_vm15  ;;  %v1343_v14 = vsel %vm659_vm7, 1.0, %v1603_v33  ;;  %v765_v37 = vrot.slane %v2267_v22, 1  ;;  %v839_v0 = vrot.slane %v1342_v52, 4  ;;  %v2291_v59 = vadd.f32 %v781_v50, %v780_v44 }
 0x1e9   : > { %v2289_v43 = vsel %vm660_vm8, 1.0, %v1603_v33  ;;  %v845_v51 = vrot.slane %v1343_v14, 4  ;;  %v2293_v2 = vadd.f32 %v1341_v47, %v833_v54  ;;  %vm605_vm10 = vcmp.eq.s32.totalorder %v1682_v11, %v588_v57 }
 0x1ea   : > { %vm606_vm11 = vcmp.eq.s32.totalorder %v1691_v18, %v588_v57  ;;  %v777_v3 = vrot.slane %v2280_v7, 1  ;;  %vm607_vm12 = vcmp.eq.s32.totalorder %v1694_v19, %v588_v57  ;;  %vm608_vm13 = vcmp.eq.s32.totalorder %v1697_v20, %v588_v57  ;;  %vm653_vm14 = vmand %vm605_vm10, %vm564_vm9 }
 0x1eb   : > { %v537_v9 = vcvt.f32.s32 %v536_v61  ;;  %v2302_v10 = vadd.f32 %v1343_v14, %v845_v51  ;;  %v851_v12 = vrot.slane %v2289_v43, 4  ;;  %vm654_vm15 = vmand %vm606_vm11, %vm564_vm9  ;;  %v1337_v13 = vsel %vm653_vm14, 1.0, %v1603_v33 }
 0x1ec   : > { %v517_v15 = vcvt.f32.s32 %v516_v63  ;;  %vm655_vm0 = vmand %vm607_vm12, %vm564_vm9  ;;  %v1338_v16 = vsel %vm654_vm15, 1.0, %v1603_v33  ;;  %v809_v32 = vrot.slane %v1337_v13, 4  ;;  %v771_v39 = vrot.slane %v2278_v58, 1 }
 0x1ed   : > { %v2312_v56 = vadd.s32 %v2208_v45, %v537_v9  ;;  %v556_v36 = vpop.xlane.xlu0 %555  ;;  %vm656_vm1 = vmand %vm608_vm13, %vm564_vm9  ;;  %v1339_v60 = vsel %vm655_vm0, 1.0, %v1603_v33  ;;  %v815_v1 = vrot.slane %v1338_v16, 4  ;;  %v795_v45 = vrot.slane %v2254_v53, 1 }
 0x1ee   : > { %v520_v40 = vadd.s32 %v2189_v17, %v517_v15  ;;  %v557_v41 = vcvt.f32.s32 %v556_v36  ;;  %v1340_v42 = vsel %vm656_vm1, 1.0, %v1603_v33  ;;  %v2320_v25 = vadd.f32 %v1337_v13, %v809_v32 }
 0x1ef   : > { %v821_v26 = vrot.slane %v1339_v60, 4  ;;  %v827_v5 = vrot.slane %v1340_v42, 4  ;;  %vm575_vm2 = vcmp.ge.s32.totalorder %v2312_v56, 512  ;;  %v1323_v27 = vadd.s32 4294966784, %v2312_v56 }
 0x1f0   : > { %v840_v62 = vadd.f32 %v1342_v52, %v839_v0  ;;  %v816_v28 = vadd.f32 %v1338_v16, %v815_v1  ;;  %vm567_vm3 = vcmp.lt.s32.totalorder %v2312_v56, 1024  ;;  %vm574_vm4 = vcmp.ge.s32.totalorder %v520_v40, 512 }
 0x1f1   : > { %v2325_v29 = vadd.f32 %v1339_v60, %v821_v26  ;;  %vm1057_vm5 = vcmask 1041409   ;;  %v811_v17 = vrot.slane %v2320_v25, 2  ;;  %v2330_v31 = vsel %vm575_vm2, %v1323_v27, %v2312_v56 }
 0x1f2   : > { %v1322_v21 = vadd.s32 4294966784, %v520_v40  ;;  %v2333_v30 = vadd.s32 %v2210_v46, %v557_v41  ;;  %vm1059_vm6 = vcmask 1042434   ;;  %v2336_v24 = vadd.f32 %v1340_v42, %v827_v5 }
 0x1f3   : > { %v823_v44 = vrot.slane %v2325_v29, 2  ;;  %vm618_vm7 = vcmp.eq.s32.totalorder %v1691_v18, %v2330_v31  ;;  %vm566_vm8 = vcmp.lt.s32.totalorder %v520_v40, 1024  ;;  %vm620_vm9 = vcmp.eq.s32.totalorder %v1697_v20, %v2330_v31 }
 0x1f4   : > { %v590_v47 = vsel %vm574_vm4, %v1322_v21, %v520_v40  ;;  %vm568_vm10 = vcmp.lt.s32.totalorder %v2333_v30, 1024  ;;  %vm576_vm11 = vcmp.ge.s32.totalorder %v2333_v30, 512  ;;  %vm1061_vm0 = vcmask 1043459  }
 0x1f5   : > { %vm613_vm12 = vcmp.eq.s32.totalorder %v1682_v11, %v590_v47  ;;  %vm614_vm13 = vcmp.eq.s32.totalorder %v1691_v18, %v590_v47  ;;  %vm615_vm14 = vcmp.eq.s32.totalorder %v1694_v19, %v590_v47  ;;  %vm616_vm15 = vcmp.eq.s32.totalorder %v1697_v20, %v590_v47 }
 0x1f6   : > { %vm661_vm1 = vmand %vm613_vm12, %vm566_vm8  ;;  %v1324_v46 = vadd.s32 4294966784, %v2333_v30  ;;  %v772_v50 = vadd.f32 %v771_v39, %v2278_v58  ;;  %v796_v52 = vadd.f32 %v795_v45, %v2254_v53  ;;  %v817_v54 = vrot.slane %v816_v28, 2 }
 0x1f7   : > { %vm1063_vm2 = vcmask 1044484   ;;  %vm662_vm4 = vmand %vm614_vm13, %vm566_vm8  ;;  %v2354_v57 = vsel %vm661_vm1, 1.0, %v1603_v33  ;;  %v841_v63 = vrot.slane %v840_v62, 2  ;;  %v930_v14 = vmul.f32 0.125, %v2249_v38 }
 0x1f8   : > { %v783_v61 = vrot.slane %v2291_v59, 1  ;;  %vm663_vm12 = vmand %vm615_vm14, %vm566_vm8  ;;  %v857_v0 = vrot.slane %v2354_v57, 4  ;;  %v2363_v53 = vsel %vm576_vm11, %v1324_v46, %v2333_v30  ;;  %v1346_v58 = vsel %vm662_vm4, 1.0, %v1603_v33 }
 0x1f9   : > { %v818_v51 = vadd.f32 %v817_v54, %v816_v28  ;;  %vm2369_vm13 = vmand %vm616_vm15, %vm566_vm8  ;;  %v2374_v38 = vsel %vm663_vm12, 1.0, %v1603_v33  ;;  %vm622_vm14 = vcmp.eq.s32.totalorder %v1691_v18, %v2363_v53  ;;  %v842_v13 = vadd.f32 %v841_v63, %v840_v62 }
 0x1fa   : > { %v863_v15 = vrot.slane %v1346_v58, 4  ;;  %v869_v16 = vrot.slane %v2374_v38, 4  ;;  %vm666_vm11 = vmand %vm618_vm7, %vm567_vm3  ;;  %v934_v36 = vmul.f32 0.125, %v772_v50  ;;  %v938_v39 = vmul.f32 0.125, %v796_v52 }
 0x1fb   : > { %v819_v32 = vrot.slane %v818_v51, 1  ;;  %vm670_vm8 = vmand %vm622_vm14, %vm568_vm10  ;;  %v1350_v60 = vsel %vm666_vm11, 1.0, %v1603_v33  ;;  %v843_v1 = vrot.slane %v842_v13, 1  ;;  %vm624_vm15 = vcmp.eq.s32.totalorder %v1697_v20, %v2363_v53 }
 0x1fc   : > { %v864_v40 = vadd.f32 %v1346_v58, %v863_v15  ;;  %v1354_v41 = vsel %vm670_vm8, 1.0, %v1603_v33  ;;  %v887_v26 = vrot.slane %v1350_v60, 4  ;;  %vm1065_vm1 = vcmask 1045509   ;;  %vm668_vm7 = vmand %vm620_vm9, %vm567_vm3 }
 0x1fd   : > { %v820_v42 = vadd.f32 %v819_v32, %v818_v51  ;;  %v1071_v18 = vsel %vm1057_vm5, %v934_v36, %v930_v14  ;;  %v844_v45 = vadd.f32 %v843_v1, %v842_v13  ;;  %v911_v27 = vrot.slane %v1354_v41, 4  ;;  %vm672_vm4 = vmand %vm624_vm15, %vm568_vm10 }
 0x1fe   : > { %v865_v5 = vrot.slane %v864_v40, 2  ;;  %v1072_v62 = vsel %vm1059_vm6, %v938_v39, %v1071_v18  ;;  %v888_v28 = vadd.f32 %v1350_v60, %v887_v26  ;;  %v1348_v47 = vsel %vm2369_vm13, 1.0, %v1603_v33 }
 0x1ff   : > { %v942_v21 = vmul.f32 0.125, %v820_v42  ;;  %v1352_v46 = vsel %vm668_vm7, 1.0, %v1603_v33  ;;  %vm617_vm12 = vcmp.eq.s32.totalorder %v1682_v11, %v2330_v31  ;;  %v912_v50 = vadd.f32 %v1354_v41, %v911_v27 }
 0x200   : > { %v866_v20 = vadd.f32 %v865_v5, %v864_v40  ;;  %v946_v52 = vmul.f32 0.125, %v844_v45  ;;  %vm1067_vm9 = vcmask 1046534   ;;  %v1356_v54 = vsel %vm672_vm4, 1.0, %v1603_v33  ;;  %vm2426_vm11 = vmand %vm617_vm12, %vm567_vm3 }
 0x201   : > { %v889_v63 = vrot.slane %v888_v28, 2  ;;  %vm1069_vm14 = vcmask 1047559   ;;  %v1073_v14 = vsel %vm1061_vm0, %v942_v21, %v1072_v62  ;;  %v784_v58 = vadd.f32 %v783_v61, %v2291_v59 }
 0x202   : > { %v806_v51 = vadd.f32 %v805_v35, %v2228_v8  ;;  %v867_v9 = vrot.slane %v866_v20, 1  ;;  %v913_v13 = vrot.slane %v912_v50, 2  ;;  %v1074_v15 = vsel %vm1063_vm2, %v946_v52, %v1073_v14 }
 0x203   : > { %v829_v32 = vrot.slane %v2336_v24, 2  ;;  %v890_v36 = vadd.f32 %v889_v63, %v888_v28  ;;  %v852_v60 = vadd.f32 %v2289_v43, %v851_v12  ;;  %v875_v1 = vrot.slane %v1348_v47, 4 }
 0x204   : > { %v807_v39 = vrot.slane %v806_v51, 1  ;;  %v868_v40 = vadd.f32 %v867_v9, %v866_v20  ;;  %v914_v41 = vadd.f32 %v913_v13, %v912_v50  ;;  %v899_v61 = vrot.slane %v1352_v46, 4 }
 0x205   : > { %v830_v59 = vadd.f32 %v829_v32, %v2336_v24  ;;  %v891_v42 = vrot.slane %v890_v36, 1  ;;  %v853_v35 = vrot.slane %v852_v60, 2  ;;  %v876_v26 = vadd.f32 %v1348_v47, %v875_v1 }
 0x206   : > { %v808_v8 = vadd.f32 %v807_v39, %v806_v51  ;;  %v915_v18 = vrot.slane %v914_v41, 1  ;;  %v950_v45 = vmul.f32 0.125, %v868_v40  ;;  %v900_v27 = vadd.f32 %v1352_v46, %v899_v61 }
 0x207   : > { %v831_v5 = vrot.slane %v830_v59, 1  ;;  %v892_v62 = vadd.f32 %v891_v42, %v890_v36  ;;  %v854_v28 = vadd.f32 %v853_v35, %v852_v60  ;;  %v877_v21 = vrot.slane %v876_v26, 2 }
 0x208   : > { %v923_v52 = vrot.slane %v1356_v54, 4  ;;  %v916_v63 = vadd.f32 %v915_v18, %v914_v41  ;;  %v1075_v43 = vsel %vm1065_vm1, %v950_v45, %v1074_v15  ;;  %v901_v20 = vrot.slane %v900_v27, 2 }
 0x209   : > { %v832_v12 = vadd.f32 %v831_v5, %v830_v59  ;;  %v954_v50 = vmul.f32 0.125, %v892_v62  ;;  %v855_v24 = vrot.slane %v854_v28, 1  ;;  %v878_v14 = vadd.f32 %v877_v21, %v876_v26 }
 0x20a   : > { %v924_v9 = vadd.f32 %v1356_v54, %v923_v52  ;;  %v958_v51 = vmul.f32 0.125, %v916_v63  ;;  %v902_v13 = vadd.f32 %v901_v20, %v900_v27  ;;  %v932_v47 = vmul.f32 0.125, %v2271_v48 }
 0x20b   : > { %v936_v32 = vmul.f32 0.125, %v784_v58  ;;  %vm619_vm13 = vcmp.eq.s32.totalorder %v1694_v19, %v2330_v31  ;;  %v1076_v15 = vsel %vm1067_vm9, %v954_v50, %v1075_v43  ;;  %v856_v54 = vadd.f32 %v855_v24, %v854_v28 }
 0x20c   : > { %v879_v36 = vrot.slane %v878_v14, 1  ;;  %v925_v39 = vrot.slane %v924_v9, 2  ;;  %v1077_v48 = vsel %vm1069_vm14, %v958_v51, %v1076_v15  ;;  %v903_v58 = vrot.slane %v902_v13, 1  ;;  %vm2468_vm7 = vmand %vm619_vm13, %vm567_vm3 }
 0x20d   : > { %v940_v60 = vmul.f32 0.125, %v808_v8  ;;  %v944_v1 = vmul.f32 0.125, %v832_v12  ;;  %1160 = vmatprep.mubr.f32.mxu0 %v1077_v48  ;;  %v948_v59 = vmul.f32 0.125, %v856_v54  ;;  %v1085_v61 = vsel %vm1057_vm5, %v936_v32, %v932_v47 }
 0x20e   : > { %v880_v40 = vadd.f32 %v879_v36, %v878_v14  ;;  %v926_v41 = vadd.f32 %v925_v39, %v924_v9  ;;  %v904_v42 = vadd.f32 %v903_v58, %v902_v13  ;;  %vm621_vm8 = vcmp.eq.s32.totalorder %v1682_v11, %v2363_v53 }
 0x20f   : > { %v1086_v35 = vsel %vm1059_vm6, %v940_v60, %v1085_v61  ;;  %v1349_v26 = vsel %vm2426_vm11, 1.0, %v1603_v33  ;;  %vm669_vm15 = vmand %vm621_vm8, %vm568_vm10  ;;  %v742_v5 = vadd.f32 %v741_v4, %v2214_v23  ;;  %v766_v28 = vadd.f32 %v765_v37, %v2267_v22 }
 0x210   : > { %v927_v18 = vrot.slane %v926_v41, 1  ;;  %v952_v45 = vmul.f32 0.125, %v880_v40  ;;  %v1087_v8 = vsel %vm1061_vm0, %v944_v1, %v1086_v35  ;;  %v956_v27 = vmul.f32 0.125, %v904_v42 }
 0x211   : > { %v1088_v62 = vsel %vm1063_vm2, %v948_v59, %v1087_v8  ;;  %v1353_v11 = vsel %vm669_vm15, 1.0, %v1603_v33  ;;  %v789_v63 = vrot.slane %v2234_v49, 1  ;;  %v812_v43 = vadd.f32 %v811_v17, %v2320_v25 }
 0x212   : > { %v928_v21 = vadd.f32 %v927_v18, %v926_v41  ;;  %v1089_v52 = vsel %vm1065_vm1, %v952_v45, %v1088_v62  ;;  %v835_v4 = vrot.slane %v2293_v2, 2  ;;  %v858_v12 = vadd.f32 %v2354_v57, %v857_v0 }
 0x213   : > { %v1090_v23 = vsel %vm1067_vm9, %v956_v27, %v1089_v52  ;;  %v881_v20 = vrot.slane %v1349_v26, 4  ;;  %v790_v22 = vadd.f32 %v789_v63, %v2234_v49  ;;  %v813_v37 = vrot.slane %v812_v43, 1 }
 0x214   : > { %v960_v50 = vmul.f32 0.125, %v928_v21  ;;  %v905_v24 = vrot.slane %v1353_v11, 4  ;;  %v836_v14 = vadd.f32 %v835_v4, %v2293_v2  ;;  %v859_v9 = vrot.slane %v858_v12, 2 }
 0x215   : > { %v882_v51 = vadd.f32 %v1349_v26, %v881_v20  ;;  %v929_v13 = vmul.f32 0.125, %v742_v5  ;;  %v814_v17 = vadd.f32 %v813_v37, %v812_v43  ;;  %v933_v32 = vmul.f32 0.125, %v766_v28 }
 0x216   : > { %v1091_v25 = vsel %vm1069_vm14, %v960_v50, %v1090_v23  ;;  %v906_v47 = vadd.f32 %v1353_v11, %v905_v24  ;;  %v837_v49 = vrot.slane %v836_v14, 1  ;;  %v860_v2 = vadd.f32 %v859_v9, %v858_v12 }
 0x217   : > { %1230 = vmatprep.mubr.f32.mxu1 %v1091_v25  ;;  %v883_v0 = vrot.slane %v882_v51, 2  ;;  %v937_v46 = vmul.f32 0.125, %v790_v22  ;;  %v941_v54 = vmul.f32 0.125, %v814_v17  ;;  %v1058_v36 = vsel %vm1057_vm5, %v933_v32, %v929_v13 }
 0x218   : > { %v907_v15 = vrot.slane %v906_v47, 2  ;;  %vm623_vm4 = vcmp.eq.s32.totalorder %v1694_v19, %v2363_v53  ;;  %v838_v56 = vadd.f32 %v837_v49, %v836_v14  ;;  %v861_v39 = vrot.slane %v860_v2, 1 }
 0x219   : > { %v884_v48 = vadd.f32 %v883_v0, %v882_v51  ;;  %v1060_v31 = vsel %vm1059_vm6, %v937_v46, %v1058_v36  ;;  %vm671_vm3 = vmand %vm623_vm4, %vm568_vm10  ;;  %v1351_v1 = vsel %vm2468_vm7, 1.0, %v1603_v33  ;;  %v754_v53 = vadd.f32 %v753_v6, %v2218_v55 }
 0x21a   : > { %v908_v58 = vadd.f32 %v907_v15, %v906_v47  ;;  %v1062_v60 = vsel %vm1061_vm0, %v941_v54, %v1060_v31  ;;  %v1355_v40 = vsel %vm671_vm3, 1.0, %v1603_v33  ;;  %v862_v41 = vadd.f32 %v861_v39, %v860_v2 }
 0x21b   : > { %v885_v59 = vrot.slane %v884_v48, 1  ;;  %v945_v19 = vmul.f32 0.125, %v838_v56  ;;  %v778_v30 = vadd.f32 %v777_v3, %v2280_v7  ;;  %v801_v42 = vrot.slane %v2243_v34, 1 }
 0x21c   : > { %v909_v61 = vrot.slane %v908_v58, 1  ;;  %v824_v35 = vadd.f32 %v823_v44, %v2325_v29  ;;  %v949_v33 = vmul.f32 0.125, %v862_v41  ;;  %v847_v45 = vrot.slane %v2302_v10, 2 }
 0x21d   : > { %v886_v26 = vadd.f32 %v885_v59, %v884_v48  ;;  %v1064_v18 = vsel %vm1063_vm2, %v945_v19, %v1062_v60  ;;  %v802_v55 = vadd.f32 %v801_v42, %v2243_v34  ;;  %v870_v7 = vadd.f32 %v2374_v38, %v869_v16 }
 0x21e   : > { %v910_v8 = vadd.f32 %v909_v61, %v908_v58  ;;  %v825_v6 = vrot.slane %v824_v35, 1  ;;  %v1066_v5 = vsel %vm1065_vm1, %v949_v33, %v1064_v18  ;;  %v848_v27 = vadd.f32 %v847_v45, %v2302_v10 }
 0x21f   : > { %v953_v3 = vmul.f32 0.125, %v886_v26  ;;  %v893_v29 = vrot.slane %v1351_v1, 4  ;;  %v871_v11 = vrot.slane %v870_v7, 2  ;;  %v917_v28 = vrot.slane %v1355_v40, 4 }
 0x220   : > { %v957_v44 = vmul.f32 0.125, %v910_v8  ;;  %v826_v62 = vadd.f32 %v825_v6, %v824_v35  ;;  %v849_v52 = vrot.slane %v848_v27, 1  ;;  %v931_v34 = vmul.f32 0.125, %v754_v53 }
 0x221   : > { %v1068_v21 = vsel %vm1067_vm9, %v953_v3, %v1066_v5  ;;  %v894_v63 = vadd.f32 %v1351_v1, %v893_v29  ;;  %v872_v23 = vadd.f32 %v871_v11, %v870_v7  ;;  %v918_v4 = vadd.f32 %v1355_v40, %v917_v28 }
 0x222   : > { %v1070_v43 = vsel %vm1069_vm14, %v957_v44, %v1068_v21  ;;  %v935_v38 = vmul.f32 0.125, %v778_v30  ;;  %v850_v16 = vadd.f32 %v849_v52, %v848_v27  ;;  %v939_v20 = vmul.f32 0.125, %v802_v55 }
 0x223   : > { %1161 = vmatmul.mubr.f32.vlgmr.msra.gmra.mrb[0].mxu0 %v1070_v43  ;;  %v895_v12 = vrot.slane %v894_v63, 2  ;;  %v943_v10 = vmul.f32 0.125, %v826_v62  ;;  %v873_v50 = vrot.slane %v872_v23, 1  ;;  %v919_v22 = vrot.slane %v918_v4, 2 }
 0x224   : > { %v1078_v37 = vsel %vm1057_vm5, %v935_v38, %v931_v34  ;;  %v947_v14 = vmul.f32 0.125, %v850_v16 }
 0x225   : > { %v896_v24 = vadd.f32 %v895_v12, %v894_v63  ;;  %v1079_v9 = vsel %vm1059_vm6, %v939_v20, %v1078_v37  ;;  %v874_v51 = vadd.f32 %v873_v50, %v872_v23  ;;  %v920_v13 = vadd.f32 %v919_v22, %v918_v4 }
 0x226   : > { %v1080_v25 = vsel %vm1061_vm0, %v943_v10, %v1079_v9 }
 0x227   : > { %v897_v17 = vrot.slane %v896_v24, 1  ;;  %v1081_v47 = vsel %vm1063_vm2, %v947_v14, %v1080_v25  ;;  %v921_v32 = vrot.slane %v920_v13, 1  ;;  %v951_v57 = vmul.f32 0.125, %v874_v51 }
 0x229   : > { %v898_v49 = vadd.f32 %v897_v17, %v896_v24  ;;  %v922_v2 = vadd.f32 %v921_v32, %v920_v13  ;;  %v1082_v0 = vsel %vm1065_vm1, %v951_v57, %v1081_v47 }
 0x22b   : > { %v955_v46 = vmul.f32 0.125, %v898_v49  ;;  %v959_v15 = vmul.f32 0.125, %v922_v2 }
 0x22d   : > { %v1083_v54 = vsel %vm1067_vm9, %v955_v46, %v1082_v0 }
 0x22e   : > { %v1084_v36 = vsel %vm1069_vm14, %v959_v15, %v1083_v54 }
 0x22f   : > { %1231 = vmatmul.mubr.f32.vlgmr.msra.gmra.mrb[0].mxu1 %v1084_v36 }
 0x2f6   : > { %v1393_v56 = vpop.f32.mrb[0].mxu0 }
 0x2f7   : > { %v1394_v39 = vpop.f32.mrb[1].mxu0 }
 0x2f8   : > { %v1395_v48 = vadd.f32 %v1394_v39, %v1393_v56 }
 0x302   : > { %v1428_v31 = vpop.f32.mrb[0].mxu1 }
 0x303   : > { %v1429_v58 = vpop.f32.mrb[1].mxu1 }
 0x304   : > { %v1430_v60 = vadd.f32 %v1429_v58, %v1428_v31 }
 0x306   : > { %v1233_v1 = vadd.f32 %v1430_v60, %v1395_v48 }
 0x308   : > { %1236 = vst [vmem:[%s191_s5] sm:$0xff] %v1233_v1 }
 0x309   : > { %1551 = shalt.err (!%p1548_p3)
}
 0x30a   : > { %s1552_s14 = scalar_lea.hbm %s2515_s9, 128  ;;  %s1556_s23 = scalar_lea.hbm %s2561_s4, 256 }
 0x30b   : > { %p1553_p4 = scmp.ne.s32.totalorder %s2515_s9, %s1552_s14  ;;  %p1557_p9 = scmp.lt.u32.totalorder %s2515_s9, %s2561_s4 }
 0x30c   : > { %p1558_p10 = scmp.lt.u32.totalorder %s1556_s23, %s1552_s14  ;;  %p1560_p12 = scmp.lt.u32.totalorder %s1552_s14, %s2515_s9 }
 0x30d   : > { %p1554_p7 = pnand %p1553_p4, %p1668_p5 }
 0x30e   : > { %p1559_p11 = por %p1558_p10, %p1557_p9 }
 0x30f   : > { %p1555_p8 = pneg %p1554_p7 }
 0x310   : > { %p1561_p13 = por %p1560_p12, %p1559_p11 }
 0x312   : > { %p1562_p0 = pnand %p1561_p13, %p1555_p8 }
 0x314   : > { %1565 = shalt.err (!%p1562_p0)
}
 0x315   : > { %1495 = dma.vmem_to_hbm [thread:$0]  (%p1668_p5), %s2517_s6, 128, %s2515_s9, %s1238_s10  }
 0x316 PF: > { %p1501_p1 = scmp.ge.s32.totalorder %s1600_s18, 2  ;;  %s1263_s29 = sand.u32 1, %s1588_s15  }
 0x317   : > { %s1264_s30 = scalar_lea.sflag [#allocation3], %s1263_s29 }
 0x318   : > { %p1498_p2 = pnand %p1501_p1, %p1672_p6 }
 0x31a   : > { %1583 = dma.done.wait (!%p1498_p2), %s1264_s30, 128  }
 0x31b   : > { %1585 = vsyncadd (!%p1498_p2), %s1264_s30, 4294967168  ;;  %p14_p3 = scmp.ge.s32.totalorder %s1655_s21, 4   ;;  %s2570_s15 = smov %s1592_s16 }
 0x31c   : > { %s2571_s16 = smov %s1596_s17  ;;  %s2572_s17 = smov %s1666_s24 }
 0x31d   : > { %s2573_s18 = smov %s1655_s21  ;;  %16 = sbr.rel (!%p14_p3) target bundleno = 3 (0x3), region = 71 }
 0x324   :  { %1269 = vsyncpa [#allocation3], 1 }
 0x325   :  { %1271 = vsyncpa [#allocation3 + $0x1], 1 }

// kernel: tsp_tour_encoder.1
= control target key start
LH: loop header
LB: loop body
LE: loop exit
PB: predicated region body
PF: predicated region fallthrough
CT: control target
= control target key end

     0   :  { %9 = vsyncpa [#allocation3], 0  ;;  %s2557_s0 = inlined_call_operand.vmem [shape: s32[128,1], index: 0, kind: input, shape index: {}]   ;;  %s2558_s1 = inlined_call_operand.vmem [shape: s32[1,512], index: 1, kind: input, shape index: {}]   ;;  %s2559_s2 = inlined_call_operand.vmem [shape: s32[1,512], index: 2, kind: input, shape index: {}]   ;;  %s2560_s3 = inlined_call_operand.vmem [shape: f32[512,128], index: 3, kind: input, shape index: {}]   ;;  %s2561_s4 = inlined_call_operand.hbm [shape: f32[16,128], index: 4, kind: output, shape index: {}]  }
   0x1   :  { %11 = vsyncpa [#allocation3 + $0x1], 0  ;;  %s1630_s15 = smov 0   ;;  %s1632_s16 = smov 0  }
   0x2   :  { %s1634_s17 = smov 0   ;;  %s1636_s18 = smov 0  }
   0x3 LB: > { %s1651_s19 = sadd.s32 4294967295, %s1600_s18   ;;  %s1310_s20 = sadd.s32 4294967294, %s1600_s18   ;;  %s1600_s18 = sphi %s1636_s18, %s2573_s18   ;;  %s1596_s17 = sphi %s1634_s17, %s2572_s17   ;;  %s1592_s16 = sphi %s1632_s16, %s2571_s16   ;;  %s1588_s15 = sphi %s1630_s15, %s2570_s15  }
   0x4   : > { %s1655_s21 = sadd.s32 1, %s1600_s18   ;;  %s113_s22 = sadd.s32 1, %s1596_s17 }
   0x5   : > { %s110_s23 = ssub.s32 %s1600_s18, %s1655_s21  ;;  %p123_p0 = scmp.ne.s32.totalorder %s1596_s17, %s1592_s16 }
   0x6   : > { %p111_p1 = scmp.eq.s32.totalorder %s110_s23, 0  ;;  %p124_p2 = scmp.eq.s32.totalorder %s1651_s19, 1 }
   0x7   : > { %p129_p3 = scmp.ne.s32.totalorder %s1592_s16, %s1588_s15  ;;  %p130_p4 = scmp.eq.s32.totalorder %s1310_s20, 1 }
   0x8   : > { %s1666_s24 = scalar_select %p111_p1, %s1596_s17, %s113_s22  }
   0x9   : > { %p1668_p5 = por %p124_p2, %p123_p0  ;;  %p1672_p6 = por %p130_p4, %p129_p3 }
   0xa   : > { %p1313_p7 = scmp.ge.s32.totalorder %s1600_s18, 1  ;;  %p166_p8 = scmp.lt.s32.totalorder %s1600_s18, 3 }
   0xc   : > { %p167_p9 = pnand %p1313_p7, %p166_p8 }
   0xd   : > { %s1315_s27 = sshll.u32 (!%p167_p9), %s1651_s19, 3  ;;  %v1602_v0 = vmov (!%p167_p9), 0   ;;  %v232_v9 = vlaneseq (!%p167_p9)  ;;  %v206_v16 = vld [vmem:[%s2558_s1] sm:$0xf] (!%p167_p9)  ;;  %s1358_s30 = sshll.u32 (!%p167_p9), %s1651_s19, 7 }
   0xe   : > { %170 = sbr.rel (%p167_p9) target bundleno = 790 (0x316), region = 36  ;;  %1537 = vset.pattern.permute.xlu1 (!%p167_p9), %v1602_v0  ;;  %1536 = vset.pattern.permute.xlu0 (!%p167_p9), %v1602_v0  ;;  %p193_p10 = scmp.lt.s32.totalorder (!%p167_p9), %s1315_s27, 15  ;;  %v207_v17 = vld [vmem:[%s2559_s2] sm:$0xf] (!%p167_p9) }
   0xf   : > { %v233_v10 = vshrl.u32 (!%p167_p9), %v232_v9, 7  ;;  %v1682_v11 = vand.u32 (!%p167_p9), 127, %v232_v9  ;;  %s2515_s9 = scalar_lea.hbm (!%p167_p9), %s2561_s4, %s1358_s30  ;;  %s1604_s19 = smov (!%p167_p9), [#allocation2]  }
  0x10   : > { %s1542_s12 = sshll.u32 (!%p167_p9), %s1604_s19, 4  ;;  %s1543_s12 = int_to_ptr.vmem [resolvable:$false] %s1542_s12 }
  0x11   : > { %v234_v12 = vsub.s32 (!%p167_p9), 0, %v233_v10  ;;  %v238_v13 = vsub.s32 (!%p167_p9), 1, %v233_v10  ;;  %v242_v14 = vsub.s32 (!%p167_p9), 2, %v233_v10  ;;  %v246_v15 = vsub.s32 (!%p167_p9), 3, %v233_v10  ;;  %s1544_s13 = scalar_lea.vmem (!%p167_p9), %s1543_s12, 256 }
  0x12   : > { %v1691_v18 = vadd.s32 (!%p167_p9), 128, %v1682_v11  ;;  %v1694_v19 = vadd.s32 (!%p167_p9), 256, %v1682_v11  ;;  %v1697_v20 = vadd.s32 (!%p167_p9), 384, %v1682_v11  ;;  %v1716_v29 = vadd.s32 (!%p167_p9), 512, %v1682_v11 }
  0x13   : > { %v1699_v21 = vrot.slane (!%p167_p9), %v206_v16, %v234_v12  ;;  %v1701_v22 = vrot.slane (!%p167_p9), %v206_v16, %v238_v13  ;;  %v1703_v23 = vrot.slane (!%p167_p9), %v206_v16, %v242_v14  ;;  %v1705_v24 = vrot.slane (!%p167_p9), %v206_v16, %v246_v15 }
  0x14   : > { %v1707_v25 = vrot.slane (!%p167_p9), %v207_v17, %v234_v12  ;;  %v1709_v26 = vrot.slane (!%p167_p9), %v207_v17, %v238_v13  ;;  %v1711_v27 = vrot.slane (!%p167_p9), %v207_v17, %v242_v14  ;;  %v1713_v28 = vrot.slane (!%p167_p9), %v207_v17, %v246_v15 }
  0x15   : > { %s2575_s27 = smov (!%p193_p10, %s1315_s27), 15  ;;  %v1719_v30 = vadd.s32 512, %v1691_v18  ;;  %v1722_v31 = vadd.s32 512, %v1694_v19  ;;  %v1725_v32 = vadd.s32 512, %v1697_v20 }
  0x16   : > { %s1316_s28 = sshll.u32 %s2575_s27, 3 }
  0x17   : > { %s196_s5 = scalar_lea.vmem %s2557_s0, %s1316_s28  ;;  %s189_s28 = sand.u32 1, %s1592_s16  }
  0x18   : > { %v200_v1 = vld [vmem:[%s196_s5 + $0x10] sm:$0xff]  ;;  %v198_v2 = vld [vmem:[%s196_s5] sm:$0xff]  ;;  %v201_v3 = vld [vmem:[%s196_s5 + $0x18] sm:$0xff]  ;;  %s1314_s29 = sshll.u32 %s189_s28, 3  ;;  %s1238_s10 = scalar_lea.sflag [#allocation3], %s189_s28 }
  0x19   : > { %215 = vperm.xlu1 %1537, %v200_v1   ;;  %209 = vperm.xlu0 %1536, %v198_v2   ;;  %v199_v4 = vld [vmem:[%s196_s5 + $0x8] sm:$0xff]  ;;  %v202_v6 = vld [vmem:[%s196_s5 + $0x20] sm:$0xff]  ;;  %v205_v7 = vld [vmem:[%s196_s5 + $0x38] sm:$0xff] }
  0x1a   : > { %v203_v5 = vld [vmem:[%s196_s5 + $0x28] sm:$0xff]  ;;  %v204_v8 = vld [vmem:[%s196_s5 + $0x30] sm:$0xff]  ;;  %s191_s5 = scalar_lea.vmem [#allocation2], %s1314_s29 }
  0x1b   : > { %s1251_s6 = sshll.u32 %s191_s5, 4  ;;  %s2517_s6 = int_to_ptr.vmem [resolvable:$true] %s1251_s6 }
  0x1c   : > { %s1538_s11 = scalar_lea.vmem %s2517_s6, 128  ;;  %p1545_p0 = scmp.lt.s32.totalorder %s2517_s6, %s1543_s12 }
  0x1d   : > { %218 = vperm.xlu1 %1537, %v201_v3   ;;  %212 = vperm.xlu0 %1536, %v199_v4   ;;  %p1539_p11 = scmp.ne.s32.totalorder %s2517_s6, %s1538_s11  ;;  %p1546_p1 = scmp.lt.s32.totalorder %s1544_s13, %s1538_s11 }
  0x1f   : > { %p1540_p12 = pnand %p1539_p11, %p1668_p5  ;;  %p1547_p2 = por %p1546_p1, %p1545_p0 }
  0x21   : > { %224 = vperm.xlu1 %1537, %v203_v5   ;;  %221 = vperm.xlu0 %1536, %v202_v6   ;;  %p1541_p13 = pneg %p1540_p12 }
  0x23   : > { %p1548_p3 = pnand %p1547_p2, %p1541_p13 }
  0x25   : > { %230 = vperm.xlu1 %1537, %v205_v7   ;;  %227 = vperm.xlu0 %1536, %v204_v8  }
  0x98   : > { %v210_v33 = vpop.permute.xlu0 %209  ;;  %v216_v34 = vpop.permute.xlu1 %215 }
  0x99   : > { %vm248_vm0 = vcmp.eq.s32.totalorder %v210_v33, %v1699_v21  ;;  %vm249_vm1 = vcmp.eq.s32.totalorder %v210_v33, %v1701_v22  ;;  %vm250_vm2 = vcmp.eq.s32.totalorder %v210_v33, %v1703_v23  ;;  %vm251_vm3 = vcmp.eq.s32.totalorder %v210_v33, %v1705_v24 }
  0x9a   : > { %vm296_vm4 = vcmp.eq.s32.totalorder %v210_v33, %v1707_v25  ;;  %vm297_vm5 = vcmp.eq.s32.totalorder %v210_v33, %v1709_v26  ;;  %vm298_vm6 = vcmp.eq.s32.totalorder %v210_v33, %v1711_v27  ;;  %vm299_vm7 = vcmp.eq.s32.totalorder %v210_v33, %v1713_v28 }
  0x9b   : > { %v337_v35 = vsel %vm296_vm4, %v1716_v29, 1024  ;;  %v338_v36 = vsel %vm297_vm5, %v1719_v30, 1024  ;;  %v339_v37 = vsel %vm298_vm6, %v1722_v31, 1024  ;;  %v340_v38 = vsel %vm299_vm7, %v1725_v32, 1024 }
  0x9c   : > { %v369_v39 = vsel %vm248_vm0, %v1682_v11, %v337_v35  ;;  %v370_v40 = vsel %vm249_vm1, %v1691_v18, %v338_v36  ;;  %v371_v41 = vsel %vm250_vm2, %v1694_v19, %v339_v37  ;;  %v372_v42 = vsel %vm251_vm3, %v1697_v20, %v340_v38  ;;  %v213_v44 = vpop.permute.xlu0 %212  ;;  %v219_v59 = vpop.permute.xlu1 %218 }
  0x9d   : > { %vm401_vm8 = vcmp.lt.s32.totalorder %v369_v39, %v370_v40  ;;  %vm256_vm9 = vcmp.eq.s32.totalorder %v216_v34, %v1699_v21  ;;  %vm257_vm10 = vcmp.eq.s32.totalorder %v216_v34, %v1701_v22  ;;  %vm258_vm11 = vcmp.eq.s32.totalorder %v216_v34, %v1703_v23 }
  0x9e   : > { %v402_v43 = vsel %vm401_vm8, %v369_v39, %v370_v40  ;;  %vm259_vm12 = vcmp.eq.s32.totalorder %v216_v34, %v1705_v24  ;;  %vm304_vm13 = vcmp.eq.s32.totalorder %v216_v34, %v1707_v25  ;;  %vm305_vm14 = vcmp.eq.s32.totalorder %v216_v34, %v1709_v26 }
  0x9f   : > { %vm403_vm15 = vcmp.lt.s32.totalorder %v402_v43, %v371_v41  ;;  %vm306_vm0 = vcmp.eq.s32.totalorder %v216_v34, %v1711_v27  ;;  %vm307_vm1 = vcmp.eq.s32.totalorder %v216_v34, %v1713_v28  ;;  %v345_v45 = vsel %vm304_vm13, %v1716_v29, 1024 }
  0xa0   : > { %v404_v46 = vsel %vm403_vm15, %v402_v43, %v371_v41  ;;  %v346_v47 = vsel %vm305_vm14, %v1719_v30, 1024  ;;  %v347_v48 = vsel %vm306_vm0, %v1722_v31, 1024  ;;  %v348_v49 = vsel %vm307_vm1, %v1725_v32, 1024  ;;  %v222_v9 = vpop.permute.xlu0 %221  ;;  %v225_v39 = vpop.permute.xlu1 %224 }
  0xa1   : > { %vm405_vm2 = vcmp.lt.s32.totalorder %v404_v46, %v372_v42  ;;  %v377_v50 = vsel %vm256_vm9, %v1682_v11, %v345_v45  ;;  %v378_v51 = vsel %vm257_vm10, %v1691_v18, %v346_v47  ;;  %v379_v52 = vsel %vm258_vm11, %v1694_v19, %v347_v48 }
  0xa2   : > { %v1764_v53 = vsel %vm405_vm2, %v404_v46, %v372_v42  ;;  %v380_v54 = vsel %vm259_vm12, %v1697_v20, %v348_v49  ;;  %vm441_vm3 = vcmp.lt.s32.totalorder %v377_v50, %v378_v51  ;;  %vm252_vm4 = vcmp.eq.s32.totalorder %v213_v44, %v1699_v21 }
  0xa3   : > { %v408_v55 = vshra.s32 %v1764_v53, 16  ;;  %v442_v56 = vsel %vm441_vm3, %v377_v50, %v378_v51  ;;  %vm253_vm5 = vcmp.eq.s32.totalorder %v213_v44, %v1701_v22  ;;  %vm254_vm6 = vcmp.eq.s32.totalorder %v213_v44, %v1703_v23 }
  0xa4   : > { %vm443_vm7 = vcmp.lt.s32.totalorder %v442_v56, %v379_v52  ;;  %vm255_vm8 = vcmp.eq.s32.totalorder %v213_v44, %v1705_v24  ;;  %vm300_vm9 = vcmp.eq.s32.totalorder %v213_v44, %v1707_v25  ;;  %vm301_vm10 = vcmp.eq.s32.totalorder %v213_v44, %v1709_v26 }
  0xa5   : > { %v1776_v57 = vcvt.s32.f32 %v408_v55  ;;  %v444_v58 = vsel %vm443_vm7, %v442_v56, %v379_v52  ;;  %vm302_vm11 = vcmp.eq.s32.totalorder %v213_v44, %v1711_v27  ;;  %vm303_vm12 = vcmp.eq.s32.totalorder %v213_v44, %v1713_v28 }
  0xa6   : > { %vm445_vm13 = vcmp.lt.s32.totalorder %v444_v58, %v380_v54  ;;  %v341_v60 = vsel %vm300_vm9, %v1716_v29, 1024  ;;  %v342_v61 = vsel %vm301_vm10, %v1719_v30, 1024  ;;  %v343_v62 = vsel %vm302_vm11, %v1722_v31, 1024 }
  0xa7   : > { %411 = vmin.xlane.f32.xlu0 %v1776_v57  ;;  %v1784_v63 = vsel %vm445_vm13, %v444_v58, %v380_v54  ;;  %v344_v0 = vsel %vm303_vm12, %v1725_v32, 1024  ;;  %v373_v1 = vsel %vm252_vm4, %v1682_v11, %v341_v60  ;;  %v374_v2 = vsel %vm253_vm5, %v1691_v18, %v342_v61  ;;  %v228_v54 = vpop.permute.xlu0 %227 }
  0xa8   : > { %v448_v3 = vshra.s32 %v1784_v63, 16  ;;  %v375_v4 = vsel %vm254_vm6, %v1694_v19, %v343_v62  ;;  %v376_v5 = vsel %vm255_vm8, %v1697_v20, %v344_v0  ;;  %vm421_vm14 = vcmp.lt.s32.totalorder %v373_v1, %v374_v2 }
  0xa9   : > { %v422_v6 = vsel %vm421_vm14, %v373_v1, %v374_v2  ;;  %vm260_vm15 = vcmp.eq.s32.totalorder %v219_v59, %v1699_v21  ;;  %vm261_vm0 = vcmp.eq.s32.totalorder %v219_v59, %v1701_v22  ;;  %vm262_vm1 = vcmp.eq.s32.totalorder %v219_v59, %v1703_v23 }
  0xaa   : > { %v1803_v7 = vcvt.s32.f32 %v448_v3  ;;  %vm423_vm2 = vcmp.lt.s32.totalorder %v422_v6, %v375_v4  ;;  %vm263_vm3 = vcmp.eq.s32.totalorder %v219_v59, %v1705_v24  ;;  %vm308_vm4 = vcmp.eq.s32.totalorder %v219_v59, %v1707_v25 }
  0xab   : > { %v424_v8 = vsel %vm423_vm2, %v422_v6, %v375_v4  ;;  %vm309_vm5 = vcmp.eq.s32.totalorder %v219_v59, %v1709_v26  ;;  %vm310_vm6 = vcmp.eq.s32.totalorder %v219_v59, %v1711_v27  ;;  %vm311_vm7 = vcmp.eq.s32.totalorder %v219_v59, %v1713_v28  ;;  %v231_v6 = vpop.permute.xlu1 %230 }
  0xac   : > { %451 = vmin.xlane.f32.xlu0 %v1803_v7  ;;  %vm425_vm8 = vcmp.lt.s32.totalorder %v424_v8, %v376_v5  ;;  %v349_v10 = vsel %vm308_vm4, %v1716_v29, 1024  ;;  %v350_v12 = vsel %vm309_vm5, %v1719_v30, 1024  ;;  %v351_v13 = vsel %vm310_vm6, %v1722_v31, 1024 }
  0xad   : > { %v1814_v14 = vsel %vm425_vm8, %v424_v8, %v376_v5  ;;  %v352_v15 = vsel %vm311_vm7, %v1725_v32, 1024  ;;  %v381_v16 = vsel %vm260_vm15, %v1682_v11, %v349_v10  ;;  %v382_v17 = vsel %vm261_vm0, %v1691_v18, %v350_v12 }
  0xae   : > { %v428_v33 = vshra.s32 %v1814_v14, 16  ;;  %v383_v34 = vsel %vm262_vm1, %v1694_v19, %v351_v13  ;;  %v384_v35 = vsel %vm263_vm3, %v1697_v20, %v352_v15  ;;  %vm461_vm9 = vcmp.lt.s32.totalorder %v381_v16, %v382_v17 }
  0xaf   : > { %v462_v36 = vsel %vm461_vm9, %v381_v16, %v382_v17  ;;  %vm264_vm10 = vcmp.eq.s32.totalorder %v222_v9, %v1699_v21  ;;  %vm265_vm11 = vcmp.eq.s32.totalorder %v222_v9, %v1701_v22  ;;  %vm266_vm12 = vcmp.eq.s32.totalorder %v222_v9, %v1703_v23 }
  0xb0   : > { %v1833_v37 = vcvt.s32.f32 %v428_v33  ;;  %vm463_vm13 = vcmp.lt.s32.totalorder %v462_v36, %v383_v34  ;;  %vm267_vm14 = vcmp.eq.s32.totalorder %v222_v9, %v1705_v24  ;;  %vm312_vm15 = vcmp.eq.s32.totalorder %v222_v9, %v1707_v25 }
  0xb1   : > { %v464_v38 = vsel %vm463_vm13, %v462_v36, %v383_v34  ;;  %vm313_vm0 = vcmp.eq.s32.totalorder %v222_v9, %v1709_v26  ;;  %vm314_vm1 = vcmp.eq.s32.totalorder %v222_v9, %v1711_v27  ;;  %vm315_vm2 = vcmp.eq.s32.totalorder %v222_v9, %v1713_v28 }
  0xb2   : > { %431 = vmin.xlane.f32.xlu1 %v1833_v37  ;;  %vm465_vm3 = vcmp.lt.s32.totalorder %v464_v38, %v384_v35  ;;  %v353_v40 = vsel %vm312_vm15, %v1716_v29, 1024  ;;  %v354_v41 = vsel %vm313_vm0, %v1719_v30, 1024  ;;  %v355_v42 = vsel %vm314_vm1, %v1722_v31, 1024 }
  0xb3   : > { %v1844_v43 = vsel %vm465_vm3, %v464_v38, %v384_v35  ;;  %v356_v44 = vsel %vm315_vm2, %v1725_v32, 1024  ;;  %v385_v45 = vsel %vm264_vm10, %v1682_v11, %v353_v40  ;;  %v386_v46 = vsel %vm265_vm11, %v1691_v18, %v354_v41 }
  0xb4   : > { %v468_v47 = vshra.s32 %v1844_v43, 16  ;;  %v387_v48 = vsel %vm266_vm12, %v1694_v19, %v355_v42  ;;  %v388_v49 = vsel %vm267_vm14, %v1697_v20, %v356_v44  ;;  %vm481_vm4 = vcmp.lt.s32.totalorder %v385_v45, %v386_v46 }
  0xb5   : > { %v482_v50 = vsel %vm481_vm4, %v385_v45, %v386_v46  ;;  %vm268_vm5 = vcmp.eq.s32.totalorder %v225_v39, %v1699_v21  ;;  %vm269_vm6 = vcmp.eq.s32.totalorder %v225_v39, %v1701_v22  ;;  %vm270_vm7 = vcmp.eq.s32.totalorder %v225_v39, %v1703_v23 }
  0xb6   : > { %v1863_v51 = vcvt.s32.f32 %v468_v47  ;;  %vm483_vm8 = vcmp.lt.s32.totalorder %v482_v50, %v387_v48  ;;  %vm271_vm9 = vcmp.eq.s32.totalorder %v225_v39, %v1705_v24  ;;  %vm316_vm10 = vcmp.eq.s32.totalorder %v225_v39, %v1707_v25 }
  0xb7   : > { %v484_v52 = vsel %vm483_vm8, %v482_v50, %v387_v48  ;;  %vm317_vm11 = vcmp.eq.s32.totalorder %v225_v39, %v1709_v26  ;;  %vm318_vm12 = vcmp.eq.s32.totalorder %v225_v39, %v1711_v27  ;;  %vm319_vm13 = vcmp.eq.s32.totalorder %v225_v39, %v1713_v28 }
  0xb8   : > { %471 = vmin.xlane.f32.xlu0 %v1863_v51  ;;  %vm485_vm14 = vcmp.lt.s32.totalorder %v484_v52, %v388_v49  ;;  %v357_v55 = vsel %vm316_vm10, %v1716_v29, 1024  ;;  %v358_v56 = vsel %vm317_vm11, %v1719_v30, 1024  ;;  %v359_v58 = vsel %vm318_vm12, %v1722_v31, 1024 }
  0xb9   : > { %v1874_v59 = vsel %vm485_vm14, %v484_v52, %v388_v49  ;;  %v360_v60 = vsel %vm319_vm13, %v1725_v32, 1024  ;;  %v389_v61 = vsel %vm268_vm5, %v1682_v11, %v357_v55  ;;  %v390_v62 = vsel %vm269_vm6, %v1691_v18, %v358_v56 }
  0xba   : > { %v488_v0 = vshra.s32 %v1874_v59, 16  ;;  %v391_v1 = vsel %vm270_vm7, %v1694_v19, %v359_v58  ;;  %v392_v2 = vsel %vm271_vm9, %v1697_v20, %v360_v60  ;;  %vm501_vm15 = vcmp.lt.s32.totalorder %v389_v61, %v390_v62 }
  0xbb   : > { %v502_v3 = vsel %vm501_vm15, %v389_v61, %v390_v62  ;;  %vm272_vm0 = vcmp.eq.s32.totalorder %v228_v54, %v1699_v21  ;;  %vm273_vm1 = vcmp.eq.s32.totalorder %v228_v54, %v1701_v22  ;;  %vm274_vm2 = vcmp.eq.s32.totalorder %v228_v54, %v1703_v23 }
  0xbc   : > { %v1893_v4 = vcvt.s32.f32 %v488_v0  ;;  %vm503_vm3 = vcmp.lt.s32.totalorder %v502_v3, %v391_v1  ;;  %vm275_vm4 = vcmp.eq.s32.totalorder %v228_v54, %v1705_v24  ;;  %vm320_vm5 = vcmp.eq.s32.totalorder %v228_v54, %v1707_v25 }
  0xbd   : > { %v504_v5 = vsel %vm503_vm3, %v502_v3, %v391_v1  ;;  %vm321_vm6 = vcmp.eq.s32.totalorder %v228_v54, %v1709_v26  ;;  %vm322_vm7 = vcmp.eq.s32.totalorder %v228_v54, %v1711_v27  ;;  %vm323_vm8 = vcmp.eq.s32.totalorder %v228_v54, %v1713_v28 }
  0xbe   : > { %491 = vmin.xlane.f32.xlu1 %v1893_v4  ;;  %vm505_vm9 = vcmp.lt.s32.totalorder %v504_v5, %v392_v2  ;;  %v361_v8 = vsel %vm320_vm5, %v1716_v29, 1024  ;;  %v362_v9 = vsel %vm321_vm6, %v1719_v30, 1024  ;;  %v363_v10 = vsel %vm322_vm7, %v1722_v31, 1024 }
  0xbf   : > { %v1904_v12 = vsel %vm505_vm9, %v504_v5, %v392_v2  ;;  %v364_v13 = vsel %vm323_vm8, %v1725_v32, 1024  ;;  %v393_v15 = vsel %vm272_vm0, %v1682_v11, %v361_v8  ;;  %v394_v16 = vsel %vm273_vm1, %v1691_v18, %v362_v9  ;;  %v977_v9 = vld [vmem:[%s2560_s3 + $0x80] sm:$0xff] }
  0xc0   : > { %v508_v17 = vshra.s32 %v1904_v12, 16  ;;  %v395_v33 = vsel %vm274_vm2, %v1694_v19, %v363_v10  ;;  %vm521_vm10 = vcmp.lt.s32.totalorder %v393_v15, %v394_v16  ;;  %v396_v34 = vsel %vm275_vm4, %v1697_v20, %v364_v13  ;;  %v978_v10 = vld [vmem:[%s2560_s3 + $0x88] sm:$0xff] }
  0xc1   : > { %v522_v35 = vsel %vm521_vm10, %v393_v15, %v394_v16  ;;  %vm276_vm11 = vcmp.eq.s32.totalorder %v231_v6, %v1699_v21  ;;  %vm277_vm12 = vcmp.eq.s32.totalorder %v231_v6, %v1701_v22  ;;  %vm278_vm14 = vcmp.eq.s32.totalorder %v231_v6, %v1703_v23  ;;  %v1010_v15 = vld [vmem:[%s2560_s3 + $0x188] sm:$0xff]  ;;  %v961_v16 = vld [vmem:[%s2560_s3] sm:$0xff] }
  0xc2   : > { %v1922_v36 = vcvt.s32.f32 %v508_v17  ;;  %vm523_vm13 = vcmp.lt.s32.totalorder %v522_v35, %v395_v33  ;;  %vm324_vm15 = vcmp.eq.s32.totalorder %v231_v6, %v1707_v25  ;;  %vm325_vm0 = vcmp.eq.s32.totalorder %v231_v6, %v1709_v26  ;;  %v962_v17 = vld [vmem:[%s2560_s3 + $0x8] sm:$0xff] }
  0xc3   : > { %v524_v38 = vsel %vm523_vm13, %v522_v35, %v395_v33  ;;  %vm326_vm1 = vcmp.eq.s32.totalorder %v231_v6, %v1711_v27  ;;  %vm327_vm2 = vcmp.eq.s32.totalorder %v231_v6, %v1713_v28  ;;  %v365_v39 = vsel %vm324_vm15, %v1716_v29, 1024  ;;  %v993_v35 = vld [vmem:[%s2560_s3 + $0x100] sm:$0xff] }
  0xc4   : > { %511 = vmin.xlane.f32.xlu0 %v1922_v36  ;;  %vm525_vm3 = vcmp.lt.s32.totalorder %v524_v38, %v396_v34  ;;  %v366_v40 = vsel %vm325_vm0, %v1719_v30, 1024  ;;  %v367_v41 = vsel %vm326_vm1, %v1722_v31, 1024  ;;  %v397_v25 = vsel %vm276_vm11, %v1682_v11, %v365_v39  ;;  %v979_v39 = vld [vmem:[%s2560_s3 + $0x90] sm:$0xff] }
  0xc5   : > { %v526_v42 = vsel %vm525_vm3, %v524_v38, %v396_v34  ;;  %v398_v26 = vsel %vm277_vm12, %v1691_v18, %v366_v40  ;;  %vm279_vm4 = vcmp.eq.s32.totalorder %v231_v6, %v1705_v24  ;;  %v368_v28 = vsel %vm327_vm2, %v1725_v32, 1024  ;;  %v980_v40 = vld [vmem:[%s2560_s3 + $0x98] sm:$0xff] }
  0xc6   : > { %v528_v27 = vshra.s32 %v526_v42, 16  ;;  %vm541_vm5 = vcmp.lt.s32.totalorder %v397_v25, %v398_v26  ;;  %v399_v29 = vsel %vm278_vm14, %v1694_v19, %v367_v41  ;;  %v400_v21 = vsel %vm279_vm4, %v1697_v20, %v368_v28  ;;  %v1011_v41 = vld [vmem:[%s2560_s3 + $0x190] sm:$0xff] }
  0xc7   : > { %v542_v30 = vsel %vm541_vm5, %v397_v25, %v398_v26  ;;  %v407_v24 = vand.u32 65535, %v1764_v53  ;;  %v447_v23 = vand.u32 65535, %v1784_v63  ;;  %v427_v52 = vand.u32 65535, %v1814_v14  ;;  %v1012_v25 = vld [vmem:[%s2560_s3 + $0x198] sm:$0xff]  ;;  %v963_v26 = vld [vmem:[%s2560_s3 + $0x10] sm:$0xff] }
  0xc8   : > { %v530_v31 = vcvt.s32.f32 %v528_v27  ;;  %vm543_vm6 = vcmp.lt.s32.totalorder %v542_v30, %v399_v29  ;;  %v467_v63 = vand.u32 65535, %v1844_v43  ;;  %v507_v43 = vand.u32 65535, %v1904_v12  ;;  %v1009_v12 = vld [vmem:[%s2560_s3 + $0x180] sm:$0xff]  ;;  %v964_v27 = vld [vmem:[%s2560_s3 + $0x18] sm:$0xff] }
  0xc9   : > { %v544_v44 = vsel %vm543_vm6, %v542_v30, %v399_v29  ;;  %v409_v47 = vcvt.s32.f32 %v407_v24  ;;  %v449_v50 = vcvt.s32.f32 %v447_v23  ;;  %v429_v55 = vcvt.s32.f32 %v427_v52  ;;  %v995_v30 = vld [vmem:[%s2560_s3 + $0x110] sm:$0xff]  ;;  %v1014_v24 = vld [vmem:[%s2560_s3 + $0x1a8] sm:$0xff]  ;;  %v997_v52 = vld [vmem:[%s2560_s3 + $0x120] sm:$0xff] }
  0xca   : > { %531 = vmin.xlane.f32.xlu1 %v530_v31  ;;  %vm545_vm7 = vcmp.lt.s32.totalorder %v544_v44, %v400_v21  ;;  %v469_v58 = vcvt.s32.f32 %v467_v63  ;;  %v509_v0 = vcvt.s32.f32 %v507_v43  ;;  %v1431_v13 = vpack.c.bf16 %v978_v10, %v977_v9  ;;  %v966_v23 = vld [vmem:[%s2560_s3 + $0x28] sm:$0xff]  ;;  %v984_v63 = vld [vmem:[%s2560_s3 + $0xb8] sm:$0xff]  ;;  %v969_v10 = vld [vmem:[%s2560_s3 + $0x40] sm:$0xff] }
  0xcb   : > { %v546_v22 = vsel %vm545_vm7, %v544_v44, %v400_v21  ;;  %v1463_v33 = vpack.c.bf16 %v1010_v15, %v1009_v12  ;;  %v1433_v34 = vpack.c.bf16 %v962_v17, %v961_v16  ;;  %v1467_v28 = vpack.c.bf16 %v1012_v25, %v1011_v41  ;;  %v981_v44 = vld [vmem:[%s2560_s3 + $0xa0] sm:$0xff]  ;;  %v968_v43 = vld [vmem:[%s2560_s3 + $0x38] sm:$0xff]  ;;  %v1018_v9 = vld [vmem:[%s2560_s3 + $0x1c8] sm:$0xff] }
  0xcc   : > { %v548_v45 = vshra.s32 %v546_v22, 16  ;;  %1432 = vmatprep.subr.bf16.mxu0 %v1431_v13  ;;  %v1437_v29 = vpack.c.bf16 %v964_v27, %v963_v26  ;;  %v970_v13 = vld [vmem:[%s2560_s3 + $0x48] sm:$0xff]  ;;  %v1001_v15 = vld [vmem:[%s2560_s3 + $0x140] sm:$0xff]  ;;  %v972_v41 = vld [vmem:[%s2560_s3 + $0x58] sm:$0xff] }
  0xcd   : > { %1464 = vmatprep.subr.bf16.mxu1 %v1463_v33  ;;  %1434 = vmatpush3.bf16.msra.mxu0 %v1433_v34  ;;  %v1002_v16 = vld [vmem:[%s2560_s3 + $0x148] sm:$0xff]  ;;  %v1449_v17 = vpack.c.bf16 %v970_v13, %v969_v10  ;;  %v987_v33 = vld [vmem:[%s2560_s3 + $0xd0] sm:$0xff]  ;;  %v988_v34 = vld [vmem:[%s2560_s3 + $0xd8] sm:$0xff] }
  0xce   : > { %v550_v46 = vcvt.s32.f32 %v548_v45  ;;  %v1013_v45 = vld [vmem:[%s2560_s3 + $0x1a0] sm:$0xff]  ;;  %v1003_v25 = vld [vmem:[%s2560_s3 + $0x150] sm:$0xff]  ;;  %v1004_v26 = vld [vmem:[%s2560_s3 + $0x158] sm:$0xff] }
  0xcf   : > { %v989_v27 = vld [vmem:[%s2560_s3 + $0xe0] sm:$0xff] }
  0xd0   : > { %551 = vmin.xlane.f32.xlu0 %v550_v46 }
 0x134   : > { %v1946_v32 = vpop.xlane.xlu0 %411 }
 0x135   : > { %vm413_vm8 = vcmp.eq.f32.partialorder %v1776_v57, %v1946_v32 }
 0x136   : > { %v414_v48 = vsel %vm413_vm8, %v409_v47, inf  ;;  %v965_v47 = vld [vmem:[%s2560_s3 + $0x20] sm:$0xff] }
 0x137   : > { %415 = vmin.xlane.f32.xlu1 %v414_v48  ;;  %v1471_v48 = vpack.c.bf16 %v1014_v24, %v1013_v45  ;;  %v974_v45 = vld [vmem:[%s2560_s3 + $0x68] sm:$0xff] }
 0x139   : > { %v1951_v49 = vpop.xlane.xlu0 %451 }
 0x13a   : > { %vm453_vm9 = vcmp.eq.f32.partialorder %v1803_v7, %v1951_v49  ;;  %v487_v7 = vand.u32 65535, %v1874_v59 }
 0x13b   : > { %v454_v54 = vsel %vm453_vm9, %v449_v50, inf  ;;  %v1441_v50 = vpack.c.bf16 %v966_v23, %v965_v47  ;;  %v1006_v47 = vld [vmem:[%s2560_s3 + $0x168] sm:$0xff]  ;;  %v991_v23 = vld [vmem:[%s2560_s3 + $0xf0] sm:$0xff] }
 0x13c   : > { %455 = vmin.xlane.f32.xlu1 %v454_v54  ;;  %v489_v61 = vcvt.s32.f32 %v487_v7  ;;  %v998_v54 = vld [vmem:[%s2560_s3 + $0x128] sm:$0xff]  ;;  %v1016_v7 = vld [vmem:[%s2560_s3 + $0x1b8] sm:$0xff] }
 0x13f   : > { %v1956_v53 = vpop.xlane.xlu1 %431 }
 0x140   : > { %vm433_vm10 = vcmp.eq.f32.partialorder %v1833_v37, %v1956_v53 }
 0x141   : > { %v434_v57 = vsel %vm433_vm10, %v429_v55, inf  ;;  %v983_v55 = vld [vmem:[%s2560_s3 + $0xb0] sm:$0xff] }
 0x142   : > { %435 = vmin.xlane.f32.xlu0 %v434_v57  ;;  %v1473_v57 = vpack.c.bf16 %v998_v54, %v997_v52  ;;  %v1024_v52 = vld [vmem:[%s2560_s3 + $0x1f8] sm:$0xff] }
 0x145   : > { %v1961_v56 = vpop.xlane.xlu0 %471 }
 0x146   : > { %vm473_vm11 = vcmp.eq.f32.partialorder %v1863_v51, %v1961_v56  ;;  %v527_v51 = vand.u32 65535, %v526_v42  ;;  %v1435_v42 = vpack.c.bf16 %v980_v40, %v979_v39  ;;  %v1020_v39 = vld [vmem:[%s2560_s3 + $0x1d8] sm:$0xff]  ;;  %v971_v40 = vld [vmem:[%s2560_s3 + $0x50] sm:$0xff] }
 0x147   : > { %v474_v14 = vsel %vm473_vm11, %v469_v58, inf  ;;  %v1015_v58 = vld [vmem:[%s2560_s3 + $0x1b0] sm:$0xff] }
 0x148   : > { %475 = vmin.xlane.f32.xlu0 %v474_v14  ;;  %v529_v2 = vcvt.s32.f32 %v527_v51  ;;  %1436 = vmatprep.subr.bf16.mxu0 %v1435_v42  ;;  %v1443_v14 = vpack.c.bf16 %v984_v63, %v983_v55  ;;  %v975_v63 = vld [vmem:[%s2560_s3 + $0x70] sm:$0xff] }
 0x149   : > { %1438 = vmatpush3.bf16.msra.mxu0 %v1437_v29  ;;  %v1021_v29 = vld [vmem:[%s2560_s3 + $0x1e0] sm:$0xff] }
 0x14b   : > { %v1966_v60 = vpop.xlane.xlu1 %491 }
 0x14c   : > { %vm493_vm12 = vcmp.eq.f32.partialorder %v1893_v4, %v1966_v60  ;;  %v547_v4 = vand.u32 65535, %v546_v22  ;;  %v982_v22 = vld [vmem:[%s2560_s3 + $0xa8] sm:$0xff] }
 0x14d   : > { %v494_v37 = vsel %vm493_vm12, %v489_v61, inf  ;;  %v1475_v61 = vpack.c.bf16 %v1016_v7, %v1015_v58  ;;  %v976_v58 = vld [vmem:[%s2560_s3 + $0x78] sm:$0xff] }
 0x14e   : > { %495 = vmin.xlane.f32.xlu1 %v494_v37  ;;  %v549_v6 = vcvt.s32.f32 %v547_v4  ;;  %v967_v37 = vld [vmem:[%s2560_s3 + $0x30] sm:$0xff] }
 0x14f   : > { %v1445_v51 = vpack.c.bf16 %v968_v43, %v967_v37  ;;  %v1461_v37 = vpack.c.bf16 %v976_v58, %v975_v63 }
 0x151   : > { %v1971_v62 = vpop.xlane.xlu0 %511 }
 0x152   : > { %vm513_vm13 = vcmp.eq.f32.partialorder %v1922_v36, %v1971_v62  ;;  %v994_v36 = vld [vmem:[%s2560_s3 + $0x108] sm:$0xff]  ;;  %v518_v13 = vcvt.f32.s32 %v1971_v62 }
 0x153   : > { %v514_v59 = vsel %vm513_vm13, %v509_v0, inf  ;;  %v1465_v38 = vpack.c.bf16 %v994_v36, %v993_v35  ;;  %v999_v0 = vld [vmem:[%s2560_s3 + $0x130] sm:$0xff]  ;;  %v1481_v36 = vpack.c.bf16 %v1002_v16, %v1001_v15 }
 0x154   : > { %515 = vmin.xlane.f32.xlu0 %v514_v59  ;;  %v1000_v59 = vld [vmem:[%s2560_s3 + $0x138] sm:$0xff]  ;;  %v1019_v35 = vld [vmem:[%s2560_s3 + $0x1d0] sm:$0xff] }
 0x155   : > { %1466 = vmatpush3.bf16.msra.mxu1 %v1465_v38  ;;  %v1477_v4 = vpack.c.bf16 %v1000_v59, %v999_v0  ;;  %v1451_v38 = vpack.c.bf16 %v988_v34, %v987_v33  ;;  %v1483_v42 = vpack.c.bf16 %v1020_v39, %v1019_v35  ;;  %v418_v0 = vcvt.f32.s32 %v1946_v32 }
 0x156   : > { %1468 = vmatprep.subr.bf16.mxu1 %v1467_v28  ;;  %v990_v28 = vld [vmem:[%s2560_s3 + $0xe8] sm:$0xff]  ;;  %v1603_v33 = vmov 0.0  }
 0x157   : > { %v1975_v1 = vpop.xlane.xlu1 %531  ;;  %v419_v59 = vshll.u32 %v418_v0, 16 }
 0x158   : > { %vm533_vm14 = vcmp.eq.f32.partialorder %v530_v31, %v1975_v1  ;;  %v996_v31 = vld [vmem:[%s2560_s3 + $0x118] sm:$0xff]  ;;  %v538_v62 = vcvt.f32.s32 %v1975_v1 }
 0x159   : > { %v534_v3 = vsel %vm533_vm14, %v529_v2, inf  ;;  %v1469_v21 = vpack.c.bf16 %v996_v31, %v995_v30  ;;  %v985_v2 = vld [vmem:[%s2560_s3 + $0xc0] sm:$0xff]  ;;  %v1022_v30 = vld [vmem:[%s2560_s3 + $0x1e8] sm:$0xff]  ;;  %v1453_v31 = vpack.c.bf16 %v972_v41, %v971_v40 }
 0x15a   : > { %535 = vmin.xlane.f32.xlu1 %v534_v3  ;;  %v986_v3 = vld [vmem:[%s2560_s3 + $0xc8] sm:$0xff]  ;;  %v1487_v24 = vpack.c.bf16 %v1022_v30, %v1021_v29 }
 0x15b   : > { %1470 = vmatpush3.bf16.msra.mxu1 %v1469_v21  ;;  %v1485_v21 = vpack.c.bf16 %v1004_v26, %v1003_v25 }
 0x15c   : > { %1472 = vmatprep.subr.bf16.mxu1 %v1471_v48  ;;  %v992_v48 = vld [vmem:[%s2560_s3 + $0xf8] sm:$0xff] }
 0x15d   : > { %v1978_v5 = vpop.xlane.xlu0 %551 }
 0x15e   : > { %vm553_vm15 = vcmp.eq.f32.partialorder %v550_v46, %v1978_v5  ;;  %v1439_v46 = vpack.c.bf16 %v982_v22, %v981_v44  ;;  %v1455_v44 = vpack.c.bf16 %v990_v28, %v989_v27  ;;  %v973_v22 = vld [vmem:[%s2560_s3 + $0x60] sm:$0xff]  ;;  %v558_v35 = vcvt.f32.s32 %v1978_v5 }
 0x15f   : > { %v554_v8 = vsel %vm553_vm15, %v549_v6, inf  ;;  %1474 = vmatpush3.bf16.msra.mxu1 %v1473_v57  ;;  %v1447_v6 = vpack.c.bf16 %v986_v3, %v985_v2  ;;  %v1457_v54 = vpack.c.bf16 %v974_v45, %v973_v22  ;;  %v1459_v57 = vpack.c.bf16 %v992_v48, %v991_v23 }
 0x160   : > { %555 = vmin.xlane.f32.xlu0 %v554_v8  ;;  %1440 = vmatprep.subr.bf16.mxu0 %v1439_v46  ;;  %v1017_v8 = vld [vmem:[%s2560_s3 + $0x1c0] sm:$0xff]  ;;  %v458_v3 = vcvt.f32.s32 %v1951_v49  ;;  %v2208_v45 = vshll.u32 %v538_v62, 16 }
 0x161   : > { %1442 = vmatpush3.bf16.msra.mxu0 %v1441_v50  ;;  %1476 = vmatprep.subr.bf16.mxu1 %v1475_v61  ;;  %v1479_v12 = vpack.c.bf16 %v1018_v9, %v1017_v8  ;;  %v1005_v46 = vld [vmem:[%s2560_s3 + $0x160] sm:$0xff]  ;;  %v1023_v50 = vld [vmem:[%s2560_s3 + $0x1f0] sm:$0xff]  ;;  %v1008_v61 = vld [vmem:[%s2560_s3 + $0x178] sm:$0xff]  ;;  %v478_v8 = vcvt.f32.s32 %v1961_v56 }
 0x162   : > { %1444 = vmatprep.subr.bf16.mxu0 %v1443_v14  ;;  %v1489_v55 = vpack.c.bf16 %v1006_v47, %v1005_v46  ;;  %v1491_v7 = vpack.c.bf16 %v1024_v52, %v1023_v50  ;;  %v1007_v14 = vld [vmem:[%s2560_s3 + $0x170] sm:$0xff]  ;;  %v459_v16 = vshll.u32 %v458_v3, 16  ;;  %v2210_v46 = vshll.u32 %v558_v35, 16 }
 0x163   : > { %1478 = vmatpush3.bf16.msra.mxu1 %v1477_v4  ;;  %v1493_v43 = vpack.c.bf16 %v1008_v61, %v1007_v14 }
 0x164   : > { %1480 = vmatprep.subr.bf16.mxu1 %v1479_v12  ;;  %v498_v12 = vcvt.f32.s32 %v1966_v60 }
 0x165   : > { %1446 = vmatpush3.bf16.msra.mxu0 %v1445_v51 }
 0x166   : > { %1448 = vmatprep.subr.bf16.mxu0 %v1447_v6  ;;  %v438_v6 = vcvt.f32.s32 %v1956_v53  ;;  %v2182_v53 = vshll.u32 %v478_v8, 16  ;;  %v2186_v60 = vshll.u32 %v498_v12, 16 }
 0x167   : > { %1482 = vmatpush3.bf16.msra.mxu1 %v1481_v36 }
 0x168   : > { %1484 = vmatprep.subr.bf16.mxu1 %v1483_v42  ;;  %v439_v49 = vshll.u32 %v438_v6, 16 }
 0x169   : > { %1450 = vmatpush3.bf16.msra.mxu0 %v1449_v17  ;;  %v2189_v17 = vshll.u32 %v518_v13, 16 }
 0x16a   : > { %1452 = vmatprep.subr.bf16.mxu0 %v1451_v38 }
 0x16b   : > { %1486 = vmatpush3.bf16.msra.mxu1 %v1485_v21 }
 0x16c   : > { %1488 = vmatprep.subr.bf16.mxu1 %v1487_v24 }
 0x16d   : > { %1454 = vmatpush3.bf16.msra.mxu0 %v1453_v31 }
 0x16e   : > { %1456 = vmatprep.subr.bf16.mxu0 %v1455_v44 }
 0x16f   : > { %1490 = vmatpush3.bf16.msra.mxu1 %v1489_v55 }
 0x170   : > { %1492 = vmatprep.subr.bf16.mxu1 %v1491_v7 }
 0x171   : > { %1458 = vmatpush3.bf16.msra.mxu0 %v1457_v54 }
 0x172   : > { %1460 = vmatprep.subr.bf16.mxu0 %v1459_v57 }
 0x173   : > { %1494 = vmatpush3.bf16.msra.mxu1 %v1493_v43 }
 0x175   : > { %1462 = vmatpush3.bf16.msra.mxu0 %v1461_v37 }
 0x1c4   : > { %v416_v51 = vpop.xlane.xlu1 %415 }
 0x1c5   : > { %v417_v2 = vcvt.f32.s32 %v416_v51 }
 0x1c7   : > { %v420_v4 = vadd.s32 %v419_v59, %v417_v2 }
 0x1c9   : > { %vm569_vm0 = vcmp.ge.s32.totalorder %v420_v4, 512  ;;  %v1317_v9 = vadd.s32 4294966784, %v420_v4  ;;  %v456_v10 = vpop.xlane.xlu1 %455  ;;  %vm561_vm1 = vcmp.lt.s32.totalorder %v420_v4, 1024 }
 0x1ca   : > { %v457_v15 = vcvt.f32.s32 %v456_v10 }
 0x1cb   : > { %v585_v32 = vsel %vm569_vm0, %v1317_v9, %v420_v4 }
 0x1cc   : > { %vm593_vm2 = vcmp.eq.s32.totalorder %v1682_v11, %v585_v32  ;;  %vm594_vm3 = vcmp.eq.s32.totalorder %v1691_v18, %v585_v32  ;;  %vm595_vm4 = vcmp.eq.s32.totalorder %v1694_v19, %v585_v32  ;;  %vm596_vm5 = vcmp.eq.s32.totalorder %v1697_v20, %v585_v32 }
 0x1cd   : > { %vm641_vm6 = vmand %vm593_vm2, %vm561_vm1  ;;  %v460_v56 = vadd.s32 %v459_v16, %v457_v15 }
 0x1ce   : > { %vm642_vm7 = vmand %vm594_vm3, %vm561_vm1  ;;  %v1325_v34 = vsel %vm641_vm6, 1.0, %v1603_v33 }
 0x1cf   : > { %vm643_vm8 = vmand %vm595_vm4, %vm561_vm1  ;;  %v1326_v36 = vsel %vm642_vm7, 1.0, %v1603_v33  ;;  %v737_v38 = vrot.slane %v1325_v34, 4  ;;  %vm571_vm9 = vcmp.ge.s32.totalorder %v460_v56, 512  ;;  %v436_v39 = vpop.xlane.xlu0 %435  ;;  %v1319_v41 = vadd.s32 4294966784, %v460_v56 }
 0x1d0   : > { %vm644_vm10 = vmand %vm596_vm5, %vm561_vm1  ;;  %v1327_v1 = vsel %vm643_vm8, 1.0, %v1603_v33  ;;  %v743_v40 = vrot.slane %v1326_v36, 4  ;;  %v437_v42 = vcvt.f32.s32 %v436_v39  ;;  %vm563_vm11 = vcmp.lt.s32.totalorder %v460_v56, 1024 }
 0x1d1   : > { %v1328_v25 = vsel %vm644_vm10, 1.0, %v1603_v33  ;;  %v738_v26 = vadd.f32 %v1325_v34, %v737_v38  ;;  %v749_v5 = vrot.slane %v1327_v1, 4  ;;  %v587_v29 = vsel %vm571_vm9, %v1319_v41, %v460_v56 }
 0x1d2   : > { %v744_v27 = vadd.f32 %v1326_v36, %v743_v40  ;;  %v755_v28 = vrot.slane %v1328_v25, 4  ;;  %v2201_v30 = vadd.s32 %v439_v49, %v437_v42  ;;  %vm601_vm12 = vcmp.eq.s32.totalorder %v1682_v11, %v587_v29 }
 0x1d3   : > { %v739_v31 = vrot.slane %v738_v26, 2  ;;  %v750_v21 = vadd.f32 %v1327_v1, %v749_v5  ;;  %vm602_vm13 = vcmp.eq.s32.totalorder %v1691_v18, %v587_v29  ;;  %vm603_vm14 = vcmp.eq.s32.totalorder %v1694_v19, %v587_v29  ;;  %vm649_vm0 = vmand %vm601_vm12, %vm563_vm11 }
 0x1d4   : > { %v745_v44 = vrot.slane %v744_v27, 2  ;;  %v756_v22 = vadd.f32 %v1328_v25, %v755_v28  ;;  %vm604_vm15 = vcmp.eq.s32.totalorder %v1697_v20, %v587_v29  ;;  %vm650_vm1 = vmand %vm602_vm13, %vm563_vm11  ;;  %v1333_v47 = vsel %vm649_vm0, 1.0, %v1603_v33 }
 0x1d5   : > { %v751_v24 = vrot.slane %v750_v21, 2  ;;  %v2214_v23 = vadd.f32 %v739_v31, %v738_v26  ;;  %vm651_vm2 = vmand %vm603_vm14, %vm563_vm11  ;;  %v1334_v50 = vsel %vm650_vm1, 1.0, %v1603_v33  ;;  %v785_v52 = vrot.slane %v1333_v47, 4  ;;  %v476_v58 = vpop.xlane.xlu0 %475 }
 0x1d6   : > { %v757_v48 = vrot.slane %v756_v22, 2  ;;  %v746_v54 = vadd.f32 %v745_v44, %v744_v27  ;;  %vm652_vm3 = vmand %vm604_vm15, %vm563_vm11  ;;  %v1335_v57 = vsel %vm651_vm2, 1.0, %v1603_v33  ;;  %v791_v63 = vrot.slane %v1334_v50, 4 }
 0x1d7   : > { %v2218_v55 = vadd.f32 %v751_v24, %v750_v21  ;;  %v1336_v7 = vsel %vm652_vm3, 1.0, %v1603_v33  ;;  %v786_v14 = vadd.f32 %v1333_v47, %v785_v52  ;;  %v797_v61 = vrot.slane %v1335_v57, 4 }
 0x1d8   : > { %vm562_vm4 = vcmp.lt.s32.totalorder %v2201_v30, 1024  ;;  %v758_v37 = vadd.f32 %v757_v48, %v756_v22  ;;  %v792_v43 = vadd.f32 %v1334_v50, %v791_v63  ;;  %v803_v0 = vrot.slane %v1336_v7, 4 }
 0x1d9   : > { %vm570_vm5 = vcmp.ge.s32.totalorder %v2201_v30, 512  ;;  %v787_v51 = vrot.slane %v786_v14, 2  ;;  %v798_v59 = vadd.f32 %v1335_v57, %v797_v61  ;;  %v1318_v2 = vadd.s32 4294966784, %v2201_v30 }
 0x1da   : > { %v477_v3 = vcvt.f32.s32 %v476_v58  ;;  %v741_v4 = vrot.slane %v2214_v23, 1  ;;  %v753_v6 = vrot.slane %v2218_v55, 1  ;;  %v2228_v8 = vadd.f32 %v1336_v7, %v803_v0 }
 0x1db   : > { %v496_v9 = vpop.xlane.xlu1 %495  ;;  %v747_v10 = vrot.slane %v746_v54, 1  ;;  %v793_v12 = vrot.slane %v792_v43, 2  ;;  %v799_v13 = vrot.slane %v798_v59, 2  ;;  %v586_v15 = vsel %vm570_vm5, %v1318_v2, %v2201_v30 }
 0x1dc   : > { %v497_v16 = vcvt.f32.s32 %v496_v9  ;;  %vm597_vm6 = vcmp.eq.s32.totalorder %v1682_v11, %v586_v15  ;;  %vm598_vm7 = vcmp.eq.s32.totalorder %v1691_v18, %v586_v15  ;;  %vm599_vm8 = vcmp.eq.s32.totalorder %v1694_v19, %v586_v15 }
 0x1dd   : > { %v759_v32 = vrot.slane %v758_v37, 1  ;;  %v2234_v49 = vadd.f32 %v787_v51, %v786_v14  ;;  %vm600_vm9 = vcmp.eq.s32.totalorder %v1697_v20, %v586_v15  ;;  %vm645_vm10 = vmand %vm597_vm6, %vm562_vm4  ;;  %v2241_v62 = vadd.s32 %v2182_v53, %v477_v3 }
 0x1de   : > { %v500_v56 = vadd.s32 %v2186_v60, %v497_v16  ;;  %v2243_v34 = vadd.f32 %v799_v13, %v798_v59  ;;  %v805_v35 = vrot.slane %v2228_v8, 2  ;;  %vm646_vm11 = vmand %vm598_vm7, %vm562_vm4  ;;  %v1329_v36 = vsel %vm645_vm10, 1.0, %v1603_v33 }
 0x1df   : > { %v2249_v38 = vadd.f32 %v747_v10, %v746_v54  ;;  %vm647_vm12 = vmand %vm599_vm8, %vm562_vm4  ;;  %v1330_v39 = vsel %vm646_vm11, 1.0, %v1603_v33  ;;  %v761_v60 = vrot.slane %v1329_v36, 4  ;;  %v2254_v53 = vadd.f32 %v793_v12, %v792_v43 }
 0x1e0   : > { %vm573_vm13 = vcmp.ge.s32.totalorder %v500_v56, 512  ;;  %vm648_vm14 = vmand %vm600_vm9, %vm562_vm4  ;;  %v1331_v1 = vsel %vm647_vm12, 1.0, %v1603_v33  ;;  %v767_v40 = vrot.slane %v1330_v39, 4  ;;  %vm565_vm15 = vcmp.lt.s32.totalorder %v500_v56, 1024 }
 0x1e1   : > { %v1321_v41 = vadd.s32 4294966784, %v500_v56  ;;  %v1332_v42 = vsel %vm648_vm14, 1.0, %v1603_v33  ;;  %v762_v25 = vadd.f32 %v1329_v36, %v761_v60  ;;  %v773_v26 = vrot.slane %v1331_v1, 4  ;;  %v516_v63 = vpop.xlane.xlu0 %515 }
 0x1e2   : > { %vm572_vm0 = vcmp.ge.s32.totalorder %v2241_v62, 512  ;;  %v768_v5 = vadd.f32 %v1330_v39, %v767_v40  ;;  %v779_v27 = vrot.slane %v1332_v42, 4  ;;  %v1320_v29 = vadd.s32 4294966784, %v2241_v62 }
 0x1e3   : > { %v589_v28 = vsel %vm573_vm13, %v1321_v41, %v500_v56  ;;  %v763_v31 = vrot.slane %v762_v25, 2  ;;  %v774_v21 = vadd.f32 %v1331_v1, %v773_v26  ;;  %v2271_v48 = vadd.f32 %v759_v32, %v758_v37 }
 0x1e4   : > { %vm609_vm1 = vcmp.eq.s32.totalorder %v1682_v11, %v589_v28  ;;  %vm610_vm2 = vcmp.eq.s32.totalorder %v1691_v18, %v589_v28  ;;  %v769_v30 = vrot.slane %v768_v5, 2  ;;  %v780_v44 = vadd.f32 %v1332_v42, %v779_v27 }
 0x1e5   : > { %vm611_vm3 = vcmp.eq.s32.totalorder %v1694_v19, %v589_v28  ;;  %vm612_vm4 = vcmp.eq.s32.totalorder %v1697_v20, %v589_v28  ;;  %vm657_vm5 = vmand %vm609_vm1, %vm565_vm15  ;;  %v2267_v22 = vadd.f32 %v763_v31, %v762_v25  ;;  %v775_v24 = vrot.slane %v774_v21, 2 }
 0x1e6   : > { %vm658_vm6 = vmand %vm610_vm2, %vm565_vm15  ;;  %v1341_v47 = vsel %vm657_vm5, 1.0, %v1603_v33  ;;  %v781_v50 = vrot.slane %v780_v44, 2  ;;  %v588_v57 = vsel %vm572_vm0, %v1320_v29, %v2241_v62  ;;  %v2278_v58 = vadd.f32 %v769_v30, %v768_v5 }
 0x1e7   : > { %vm659_vm7 = vmand %vm611_vm3, %vm565_vm15  ;;  %v1342_v52 = vsel %vm658_vm6, 1.0, %v1603_v33  ;;  %v833_v54 = vrot.slane %v1341_v47, 4  ;;  %v2280_v7 = vadd.f32 %v775_v24, %v774_v21  ;;  %vm564_vm9 = vcmp.lt.s32.totalorder %v2241_v62, 1024  ;;  %v536_v61 = vpop.xlane.xlu1 %535 }
 0x1e8   : > { %vm660_vm8 = vmand %vm612_vm4, %vm565_vm15  ;;  %v1343_v14 = vsel %vm659_vm7, 1.0, %v1603_v33  ;;  %v765_v37 = vrot.slane %v2267_v22, 1  ;;  %v839_v0 = vrot.slane %v1342_v52, 4  ;;  %v2291_v59 = vadd.f32 %v781_v50, %v780_v44 }
 0x1e9   : > { %v2289_v43 = vsel %vm660_vm8, 1.0, %v1603_v33  ;;  %v845_v51 = vrot.slane %v1343_v14, 4  ;;  %v2293_v2 = vadd.f32 %v1341_v47, %v833_v54  ;;  %vm605_vm10 = vcmp.eq.s32.totalorder %v1682_v11, %v588_v57 }
 0x1ea   : > { %vm606_vm11 = vcmp.eq.s32.totalorder %v1691_v18, %v588_v57  ;;  %v777_v3 = vrot.slane %v2280_v7, 1  ;;  %vm607_vm12 = vcmp.eq.s32.totalorder %v1694_v19, %v588_v57  ;;  %vm608_vm13 = vcmp.eq.s32.totalorder %v1697_v20, %v588_v57  ;;  %vm653_vm14 = vmand %vm605_vm10, %vm564_vm9 }
 0x1eb   : > { %v537_v9 = vcvt.f32.s32 %v536_v61  ;;  %v2302_v10 = vadd.f32 %v1343_v14, %v845_v51  ;;  %v851_v12 = vrot.slane %v2289_v43, 4  ;;  %vm654_vm15 = vmand %vm606_vm11, %vm564_vm9  ;;  %v1337_v13 = vsel %vm653_vm14, 1.0, %v1603_v33 }
 0x1ec   : > { %v517_v15 = vcvt.f32.s32 %v516_v63  ;;  %vm655_vm0 = vmand %vm607_vm12, %vm564_vm9  ;;  %v1338_v16 = vsel %vm654_vm15, 1.0, %v1603_v33  ;;  %v809_v32 = vrot.slane %v1337_v13, 4  ;;  %v771_v39 = vrot.slane %v2278_v58, 1 }
 0x1ed   : > { %v2312_v56 = vadd.s32 %v2208_v45, %v537_v9  ;;  %v556_v36 = vpop.xlane.xlu0 %555  ;;  %vm656_vm1 = vmand %vm608_vm13, %vm564_vm9  ;;  %v1339_v60 = vsel %vm655_vm0, 1.0, %v1603_v33  ;;  %v815_v1 = vrot.slane %v1338_v16, 4  ;;  %v795_v45 = vrot.slane %v2254_v53, 1 }
 0x1ee   : > { %v520_v40 = vadd.s32 %v2189_v17, %v517_v15  ;;  %v557_v41 = vcvt.f32.s32 %v556_v36  ;;  %v1340_v42 = vsel %vm656_vm1, 1.0, %v1603_v33  ;;  %v2320_v25 = vadd.f32 %v1337_v13, %v809_v32 }
 0x1ef   : > { %v821_v26 = vrot.slane %v1339_v60, 4  ;;  %v827_v5 = vrot.slane %v1340_v42, 4  ;;  %vm575_vm2 = vcmp.ge.s32.totalorder %v2312_v56, 512  ;;  %v1323_v27 = vadd.s32 4294966784, %v2312_v56 }
 0x1f0   : > { %v840_v62 = vadd.f32 %v1342_v52, %v839_v0  ;;  %v816_v28 = vadd.f32 %v1338_v16, %v815_v1  ;;  %vm567_vm3 = vcmp.lt.s32.totalorder %v2312_v56, 1024  ;;  %vm574_vm4 = vcmp.ge.s32.totalorder %v520_v40, 512 }
 0x1f1   : > { %v2325_v29 = vadd.f32 %v1339_v60, %v821_v26  ;;  %vm1057_vm5 = vcmask 1041409   ;;  %v811_v17 = vrot.slane %v2320_v25, 2  ;;  %v2330_v31 = vsel %vm575_vm2, %v1323_v27, %v2312_v56 }
 0x1f2   : > { %v1322_v21 = vadd.s32 4294966784, %v520_v40  ;;  %v2333_v30 = vadd.s32 %v2210_v46, %v557_v41  ;;  %vm1059_vm6 = vcmask 1042434   ;;  %v2336_v24 = vadd.f32 %v1340_v42, %v827_v5 }
 0x1f3   : > { %v823_v44 = vrot.slane %v2325_v29, 2  ;;  %vm618_vm7 = vcmp.eq.s32.totalorder %v1691_v18, %v2330_v31  ;;  %vm566_vm8 = vcmp.lt.s32.totalorder %v520_v40, 1024  ;;  %vm620_vm9 = vcmp.eq.s32.totalorder %v1697_v20, %v2330_v31 }
 0x1f4   : > { %v590_v47 = vsel %vm574_vm4, %v1322_v21, %v520_v40  ;;  %vm568_vm10 = vcmp.lt.s32.totalorder %v2333_v30, 1024  ;;  %vm576_vm11 = vcmp.ge.s32.totalorder %v2333_v30, 512  ;;  %vm1061_vm0 = vcmask 1043459  }
 0x1f5   : > { %vm613_vm12 = vcmp.eq.s32.totalorder %v1682_v11, %v590_v47  ;;  %vm614_vm13 = vcmp.eq.s32.totalorder %v1691_v18, %v590_v47  ;;  %vm615_vm14 = vcmp.eq.s32.totalorder %v1694_v19, %v590_v47  ;;  %vm616_vm15 = vcmp.eq.s32.totalorder %v1697_v20, %v590_v47 }
 0x1f6   : > { %vm661_vm1 = vmand %vm613_vm12, %vm566_vm8  ;;  %v1324_v46 = vadd.s32 4294966784, %v2333_v30  ;;  %v772_v50 = vadd.f32 %v771_v39, %v2278_v58  ;;  %v796_v52 = vadd.f32 %v795_v45, %v2254_v53  ;;  %v817_v54 = vrot.slane %v816_v28, 2 }
 0x1f7   : > { %vm1063_vm2 = vcmask 1044484   ;;  %vm662_vm4 = vmand %vm614_vm13, %vm566_vm8  ;;  %v2354_v57 = vsel %vm661_vm1, 1.0, %v1603_v33  ;;  %v841_v63 = vrot.slane %v840_v62, 2  ;;  %v930_v14 = vmul.f32 0.125, %v2249_v38 }
 0x1f8   : > { %v783_v61 = vrot.slane %v2291_v59, 1  ;;  %vm663_vm12 = vmand %vm615_vm14, %vm566_vm8  ;;  %v857_v0 = vrot.slane %v2354_v57, 4  ;;  %v2363_v53 = vsel %vm576_vm11, %v1324_v46, %v2333_v30  ;;  %v1346_v58 = vsel %vm662_vm4, 1.0, %v1603_v33 }
 0x1f9   : > { %v818_v51 = vadd.f32 %v817_v54, %v816_v28  ;;  %vm2369_vm13 = vmand %vm616_vm15, %vm566_vm8  ;;  %v2374_v38 = vsel %vm663_vm12, 1.0, %v1603_v33  ;;  %vm622_vm14 = vcmp.eq.s32.totalorder %v1691_v18, %v2363_v53  ;;  %v842_v13 = vadd.f32 %v841_v63, %v840_v62 }
 0x1fa   : > { %v863_v15 = vrot.slane %v1346_v58, 4  ;;  %v869_v16 = vrot.slane %v2374_v38, 4  ;;  %vm666_vm11 = vmand %vm618_vm7, %vm567_vm3  ;;  %v934_v36 = vmul.f32 0.125, %v772_v50  ;;  %v938_v39 = vmul.f32 0.125, %v796_v52 }
 0x1fb   : > { %v819_v32 = vrot.slane %v818_v51, 1  ;;  %vm670_vm8 = vmand %vm622_vm14, %vm568_vm10  ;;  %v1350_v60 = vsel %vm666_vm11, 1.0, %v1603_v33  ;;  %v843_v1 = vrot.slane %v842_v13, 1  ;;  %vm624_vm15 = vcmp.eq.s32.totalorder %v1697_v20, %v2363_v53 }
 0x1fc   : > { %v864_v40 = vadd.f32 %v1346_v58, %v863_v15  ;;  %v1354_v41 = vsel %vm670_vm8, 1.0, %v1603_v33  ;;  %v887_v26 = vrot.slane %v1350_v60, 4  ;;  %vm1065_vm1 = vcmask 1045509   ;;  %vm668_vm7 = vmand %vm620_vm9, %vm567_vm3 }
 0x1fd   : > { %v820_v42 = vadd.f32 %v819_v32, %v818_v51  ;;  %v1071_v18 = vsel %vm1057_vm5, %v934_v36, %v930_v14  ;;  %v844_v45 = vadd.f32 %v843_v1, %v842_v13  ;;  %v911_v27 = vrot.slane %v1354_v41, 4  ;;  %vm672_vm4 = vmand %vm624_vm15, %vm568_vm10 }
 0x1fe   : > { %v865_v5 = vrot.slane %v864_v40, 2  ;;  %v1072_v62 = vsel %vm1059_vm6, %v938_v39, %v1071_v18  ;;  %v888_v28 = vadd.f32 %v1350_v60, %v887_v26  ;;  %v1348_v47 = vsel %vm2369_vm13, 1.0, %v1603_v33 }
 0x1ff   : > { %v942_v21 = vmul.f32 0.125, %v820_v42  ;;  %v1352_v46 = vsel %vm668_vm7, 1.0, %v1603_v33  ;;  %vm617_vm12 = vcmp.eq.s32.totalorder %v1682_v11, %v2330_v31  ;;  %v912_v50 = vadd.f32 %v1354_v41, %v911_v27 }
 0x200   : > { %v866_v20 = vadd.f32 %v865_v5, %v864_v40  ;;  %v946_v52 = vmul.f32 0.125, %v844_v45  ;;  %vm1067_vm9 = vcmask 1046534   ;;  %v1356_v54 = vsel %vm672_vm4, 1.0, %v1603_v33  ;;  %vm2426_vm11 = vmand %vm617_vm12, %vm567_vm3 }
 0x201   : > { %v889_v63 = vrot.slane %v888_v28, 2  ;;  %vm1069_vm14 = vcmask 1047559   ;;  %v1073_v14 = vsel %vm1061_vm0, %v942_v21, %v1072_v62  ;;  %v784_v58 = vadd.f32 %v783_v61, %v2291_v59 }
 0x202   : > { %v806_v51 = vadd.f32 %v805_v35, %v2228_v8  ;;  %v867_v9 = vrot.slane %v866_v20, 1  ;;  %v913_v13 = vrot.slane %v912_v50, 2  ;;  %v1074_v15 = vsel %vm1063_vm2, %v946_v52, %v1073_v14 }
 0x203   : > { %v829_v32 = vrot.slane %v2336_v24, 2  ;;  %v890_v36 = vadd.f32 %v889_v63, %v888_v28  ;;  %v852_v60 = vadd.f32 %v2289_v43, %v851_v12  ;;  %v875_v1 = vrot.slane %v1348_v47, 4 }
 0x204   : > { %v807_v39 = vrot.slane %v806_v51, 1  ;;  %v868_v40 = vadd.f32 %v867_v9, %v866_v20  ;;  %v914_v41 = vadd.f32 %v913_v13, %v912_v50  ;;  %v899_v61 = vrot.slane %v1352_v46, 4 }
 0x205   : > { %v830_v59 = vadd.f32 %v829_v32, %v2336_v24  ;;  %v891_v42 = vrot.slane %v890_v36, 1  ;;  %v853_v35 = vrot.slane %v852_v60, 2  ;;  %v876_v26 = vadd.f32 %v1348_v47, %v875_v1 }
 0x206   : > { %v808_v8 = vadd.f32 %v807_v39, %v806_v51  ;;  %v915_v18 = vrot.slane %v914_v41, 1  ;;  %v950_v45 = vmul.f32 0.125, %v868_v40  ;;  %v900_v27 = vadd.f32 %v1352_v46, %v899_v61 }
 0x207   : > { %v831_v5 = vrot.slane %v830_v59, 1  ;;  %v892_v62 = vadd.f32 %v891_v42, %v890_v36  ;;  %v854_v28 = vadd.f32 %v853_v35, %v852_v60  ;;  %v877_v21 = vrot.slane %v876_v26, 2 }
 0x208   : > { %v923_v52 = vrot.slane %v1356_v54, 4  ;;  %v916_v63 = vadd.f32 %v915_v18, %v914_v41  ;;  %v1075_v43 = vsel %vm1065_vm1, %v950_v45, %v1074_v15  ;;  %v901_v20 = vrot.slane %v900_v27, 2 }
 0x209   : > { %v832_v12 = vadd.f32 %v831_v5, %v830_v59  ;;  %v954_v50 = vmul.f32 0.125, %v892_v62  ;;  %v855_v24 = vrot.slane %v854_v28, 1  ;;  %v878_v14 = vadd.f32 %v877_v21, %v876_v26 }
 0x20a   : > { %v924_v9 = vadd.f32 %v1356_v54, %v923_v52  ;;  %v958_v51 = vmul.f32 0.125, %v916_v63  ;;  %v902_v13 = vadd.f32 %v901_v20, %v900_v27  ;;  %v932_v47 = vmul.f32 0.125, %v2271_v48 }
 0x20b   : > { %v936_v32 = vmul.f32 0.125, %v784_v58  ;;  %vm619_vm13 = vcmp.eq.s32.totalorder %v1694_v19, %v2330_v31  ;;  %v1076_v15 = vsel %vm1067_vm9, %v954_v50, %v1075_v43  ;;  %v856_v54 = vadd.f32 %v855_v24, %v854_v28 }
 0x20c   : > { %v879_v36 = vrot.slane %v878_v14, 1  ;;  %v925_v39 = vrot.slane %v924_v9, 2  ;;  %v1077_v48 = vsel %vm1069_vm14, %v958_v51, %v1076_v15  ;;  %v903_v58 = vrot.slane %v902_v13, 1  ;;  %vm2468_vm7 = vmand %vm619_vm13, %vm567_vm3 }
 0x20d   : > { %v940_v60 = vmul.f32 0.125, %v808_v8  ;;  %v944_v1 = vmul.f32 0.125, %v832_v12  ;;  %1160 = vmatprep.mubr.f32.mxu0 %v1077_v48  ;;  %v948_v59 = vmul.f32 0.125, %v856_v54  ;;  %v1085_v61 = vsel %vm1057_vm5, %v936_v32, %v932_v47 }
 0x20e   : > { %v880_v40 = vadd.f32 %v879_v36, %v878_v14  ;;  %v926_v41 = vadd.f32 %v925_v39, %v924_v9  ;;  %v904_v42 = vadd.f32 %v903_v58, %v902_v13  ;;  %vm621_vm8 = vcmp.eq.s32.totalorder %v1682_v11, %v2363_v53 }
 0x20f   : > { %v1086_v35 = vsel %vm1059_vm6, %v940_v60, %v1085_v61  ;;  %v1349_v26 = vsel %vm2426_vm11, 1.0, %v1603_v33  ;;  %vm669_vm15 = vmand %vm621_vm8, %vm568_vm10  ;;  %v742_v5 = vadd.f32 %v741_v4, %v2214_v23  ;;  %v766_v28 = vadd.f32 %v765_v37, %v2267_v22 }
 0x210   : > { %v927_v18 = vrot.slane %v926_v41, 1  ;;  %v952_v45 = vmul.f32 0.125, %v880_v40  ;;  %v1087_v8 = vsel %vm1061_vm0, %v944_v1, %v1086_v35  ;;  %v956_v27 = vmul.f32 0.125, %v904_v42 }
 0x211   : > { %v1088_v62 = vsel %vm1063_vm2, %v948_v59, %v1087_v8  ;;  %v1353_v11 = vsel %vm669_vm15, 1.0, %v1603_v33  ;;  %v789_v63 = vrot.slane %v2234_v49, 1  ;;  %v812_v43 = vadd.f32 %v811_v17, %v2320_v25 }
 0x212   : > { %v928_v21 = vadd.f32 %v927_v18, %v926_v41  ;;  %v1089_v52 = vsel %vm1065_vm1, %v952_v45, %v1088_v62  ;;  %v835_v4 = vrot.slane %v2293_v2, 2  ;;  %v858_v12 = vadd.f32 %v2354_v57, %v857_v0 }
 0x213   : > { %v1090_v23 = vsel %vm1067_vm9, %v956_v27, %v1089_v52  ;;  %v881_v20 = vrot.slane %v1349_v26, 4  ;;  %v790_v22 = vadd.f32 %v789_v63, %v2234_v49  ;;  %v813_v37 = vrot.slane %v812_v43, 1 }
 0x214   : > { %v960_v50 = vmul.f32 0.125, %v928_v21  ;;  %v905_v24 = vrot.slane %v1353_v11, 4  ;;  %v836_v14 = vadd.f32 %v835_v4, %v2293_v2  ;;  %v859_v9 = vrot.slane %v858_v12, 2 }
 0x215   : > { %v882_v51 = vadd.f32 %v1349_v26, %v881_v20  ;;  %v929_v13 = vmul.f32 0.125, %v742_v5  ;;  %v814_v17 = vadd.f32 %v813_v37, %v812_v43  ;;  %v933_v32 = vmul.f32 0.125, %v766_v28 }
 0x216   : > { %v1091_v25 = vsel %vm1069_vm14, %v960_v50, %v1090_v23  ;;  %v906_v47 = vadd.f32 %v1353_v11, %v905_v24  ;;  %v837_v49 = vrot.slane %v836_v14, 1  ;;  %v860_v2 = vadd.f32 %v859_v9, %v858_v12 }
 0x217   : > { %1230 = vmatprep.mubr.f32.mxu1 %v1091_v25  ;;  %v883_v0 = vrot.slane %v882_v51, 2  ;;  %v937_v46 = vmul.f32 0.125, %v790_v22  ;;  %v941_v54 = vmul.f32 0.125, %v814_v17  ;;  %v1058_v36 = vsel %vm1057_vm5, %v933_v32, %v929_v13 }
 0x218   : > { %v907_v15 = vrot.slane %v906_v47, 2  ;;  %vm623_vm4 = vcmp.eq.s32.totalorder %v1694_v19, %v2363_v53  ;;  %v838_v56 = vadd.f32 %v837_v49, %v836_v14  ;;  %v861_v39 = vrot.slane %v860_v2, 1 }
 0x219   : > { %v884_v48 = vadd.f32 %v883_v0, %v882_v51  ;;  %v1060_v31 = vsel %vm1059_vm6, %v937_v46, %v1058_v36  ;;  %vm671_vm3 = vmand %vm623_vm4, %vm568_vm10  ;;  %v1351_v1 = vsel %vm2468_vm7, 1.0, %v1603_v33  ;;  %v754_v53 = vadd.f32 %v753_v6, %v2218_v55 }
 0x21a   : > { %v908_v58 = vadd.f32 %v907_v15, %v906_v47  ;;  %v1062_v60 = vsel %vm1061_vm0, %v941_v54, %v1060_v31  ;;  %v1355_v40 = vsel %vm671_vm3, 1.0, %v1603_v33  ;;  %v862_v41 = vadd.f32 %v861_v39, %v860_v2 }
 0x21b   : > { %v885_v59 = vrot.slane %v884_v48, 1  ;;  %v945_v19 = vmul.f32 0.125, %v838_v56  ;;  %v778_v30 = vadd.f32 %v777_v3, %v2280_v7  ;;  %v801_v42 = vrot.slane %v2243_v34, 1 }
 0x21c   : > { %v909_v61 = vrot.slane %v908_v58, 1  ;;  %v824_v35 = vadd.f32 %v823_v44, %v2325_v29  ;;  %v949_v33 = vmul.f32 0.125, %v862_v41  ;;  %v847_v45 = vrot.slane %v2302_v10, 2 }
 0x21d   : > { %v886_v26 = vadd.f32 %v885_v59, %v884_v48  ;;  %v1064_v18 = vsel %vm1063_vm2, %v945_v19, %v1062_v60  ;;  %v802_v55 = vadd.f32 %v801_v42, %v2243_v34  ;;  %v870_v7 = vadd.f32 %v2374_v38, %v869_v16 }
 0x21e   : > { %v910_v8 = vadd.f32 %v909_v61, %v908_v58  ;;  %v825_v6 = vrot.slane %v824_v35, 1  ;;  %v1066_v5 = vsel %vm1065_vm1, %v949_v33, %v1064_v18  ;;  %v848_v27 = vadd.f32 %v847_v45, %v2302_v10 }
 0x21f   : > { %v953_v3 = vmul.f32 0.125, %v886_v26  ;;  %v893_v29 = vrot.slane %v1351_v1, 4  ;;  %v871_v11 = vrot.slane %v870_v7, 2  ;;  %v917_v28 = vrot.slane %v1355_v40, 4 }
 0x220   : > { %v957_v44 = vmul.f32 0.125, %v910_v8  ;;  %v826_v62 = vadd.f32 %v825_v6, %v824_v35  ;;  %v849_v52 = vrot.slane %v848_v27, 1  ;;  %v931_v34 = vmul.f32 0.125, %v754_v53 }
 0x221   : > { %v1068_v21 = vsel %vm1067_vm9, %v953_v3, %v1066_v5  ;;  %v894_v63 = vadd.f32 %v1351_v1, %v893_v29  ;;  %v872_v23 = vadd.f32 %v871_v11, %v870_v7  ;;  %v918_v4 = vadd.f32 %v1355_v40, %v917_v28 }
 0x222   : > { %v1070_v43 = vsel %vm1069_vm14, %v957_v44, %v1068_v21  ;;  %v935_v38 = vmul.f32 0.125, %v778_v30  ;;  %v850_v16 = vadd.f32 %v849_v52, %v848_v27  ;;  %v939_v20 = vmul.f32 0.125, %v802_v55 }
 0x223   : > { %1161 = vmatmul.mubr.f32.vlgmr.msra.gmra.mrb[0].mxu0 %v1070_v43  ;;  %v895_v12 = vrot.slane %v894_v63, 2  ;;  %v943_v10 = vmul.f32 0.125, %v826_v62  ;;  %v873_v50 = vrot.slane %v872_v23, 1  ;;  %v919_v22 = vrot.slane %v918_v4, 2 }
 0x224   : > { %v1078_v37 = vsel %vm1057_vm5, %v935_v38, %v931_v34  ;;  %v947_v14 = vmul.f32 0.125, %v850_v16 }
 0x225   : > { %v896_v24 = vadd.f32 %v895_v12, %v894_v63  ;;  %v1079_v9 = vsel %vm1059_vm6, %v939_v20, %v1078_v37  ;;  %v874_v51 = vadd.f32 %v873_v50, %v872_v23  ;;  %v920_v13 = vadd.f32 %v919_v22, %v918_v4 }
 0x226   : > { %v1080_v25 = vsel %vm1061_vm0, %v943_v10, %v1079_v9 }
 0x227   : > { %v897_v17 = vrot.slane %v896_v24, 1  ;;  %v1081_v47 = vsel %vm1063_vm2, %v947_v14, %v1080_v25  ;;  %v921_v32 = vrot.slane %v920_v13, 1  ;;  %v951_v57 = vmul.f32 0.125, %v874_v51 }
 0x229   : > { %v898_v49 = vadd.f32 %v897_v17, %v896_v24  ;;  %v922_v2 = vadd.f32 %v921_v32, %v920_v13  ;;  %v1082_v0 = vsel %vm1065_vm1, %v951_v57, %v1081_v47 }
 0x22b   : > { %v955_v46 = vmul.f32 0.125, %v898_v49  ;;  %v959_v15 = vmul.f32 0.125, %v922_v2 }
 0x22d   : > { %v1083_v54 = vsel %vm1067_vm9, %v955_v46, %v1082_v0 }
 0x22e   : > { %v1084_v36 = vsel %vm1069_vm14, %v959_v15, %v1083_v54 }
 0x22f   : > { %1231 = vmatmul.mubr.f32.vlgmr.msra.gmra.mrb[0].mxu1 %v1084_v36 }
 0x2f6   : > { %v1393_v56 = vpop.f32.mrb[0].mxu0 }
 0x2f7   : > { %v1394_v39 = vpop.f32.mrb[1].mxu0 }
 0x2f8   : > { %v1395_v48 = vadd.f32 %v1394_v39, %v1393_v56 }
 0x302   : > { %v1428_v31 = vpop.f32.mrb[0].mxu1 }
 0x303   : > { %v1429_v58 = vpop.f32.mrb[1].mxu1 }
 0x304   : > { %v1430_v60 = vadd.f32 %v1429_v58, %v1428_v31 }
 0x306   : > { %v1233_v1 = vadd.f32 %v1430_v60, %v1395_v48 }
 0x308   : > { %1236 = vst [vmem:[%s191_s5] sm:$0xff] %v1233_v1 }
 0x309   : > { %1551 = shalt.err (!%p1548_p3)
}
 0x30a   : > { %s1552_s14 = scalar_lea.hbm %s2515_s9, 128  ;;  %s1556_s23 = scalar_lea.hbm %s2561_s4, 256 }
 0x30b   : > { %p1553_p4 = scmp.ne.s32.totalorder %s2515_s9, %s1552_s14  ;;  %p1557_p9 = scmp.lt.u32.totalorder %s2515_s9, %s2561_s4 }
 0x30c   : > { %p1558_p10 = scmp.lt.u32.totalorder %s1556_s23, %s1552_s14  ;;  %p1560_p12 = scmp.lt.u32.totalorder %s1552_s14, %s2515_s9 }
 0x30d   : > { %p1554_p7 = pnand %p1553_p4, %p1668_p5 }
 0x30e   : > { %p1559_p11 = por %p1558_p10, %p1557_p9 }
 0x30f   : > { %p1555_p8 = pneg %p1554_p7 }
 0x310   : > { %p1561_p13 = por %p1560_p12, %p1559_p11 }
 0x312   : > { %p1562_p0 = pnand %p1561_p13, %p1555_p8 }
 0x314   : > { %1565 = shalt.err (!%p1562_p0)
}
 0x315   : > { %1495 = dma.vmem_to_hbm [thread:$0]  (%p1668_p5), %s2517_s6, 128, %s2515_s9, %s1238_s10  }
 0x316 PF: > { %p1501_p1 = scmp.ge.s32.totalorder %s1600_s18, 2  ;;  %s1263_s29 = sand.u32 1, %s1588_s15  }
 0x317   : > { %s1264_s30 = scalar_lea.sflag [#allocation3], %s1263_s29 }
 0x318   : > { %p1498_p2 = pnand %p1501_p1, %p1672_p6 }
 0x31a   : > { %1583 = dma.done.wait (!%p1498_p2), %s1264_s30, 128  }
 0x31b   : > { %1585 = vsyncadd (!%p1498_p2), %s1264_s30, 4294967168  ;;  %p14_p3 = scmp.ge.s32.totalorder %s1655_s21, 4   ;;  %s2570_s15 = smov %s1592_s16 }
 0x31c   : > { %s2571_s16 = smov %s1596_s17  ;;  %s2572_s17 = smov %s1666_s24 }
 0x31d   : > { %s2573_s18 = smov %s1655_s21  ;;  %16 = sbr.rel (!%p14_p3) target bundleno = 3 (0x3), region = 71 }
 0x324   :  { %1269 = vsyncpa [#allocation3], 1 }
 0x325   :  { %1271 = vsyncpa [#allocation3 + $0x1], 1 }

</bundles_post_ra>
